<compile_context>
chip_gen: v7x
topology: tpu7x:2x2x1
jax: 0.10.0
libtpu: 0.0.40
codegen_flags: <defaults>
</compile_context>

<pallas_src>
import functools

import jax
import jax.numpy as jnp
import numpy as np
from jax.experimental import pallas as pl
from jax.experimental.pallas import tpu as pltpu

LN_EPS = 1e-5  # torch.nn.LayerNorm default eps


# ----------------------------- kernel 1 -------------------------------------
def _ln_ab_kernel(m_ref, mask_ref, g_ref, beta_ref, w_ref, b_ref, ab_ref):
    x = m_ref[...].astype(jnp.float32)                       # [BR, c_m]
    mu = jnp.mean(x, axis=-1, keepdims=True)
    xc = x - mu
    var = jnp.mean(xc * xc, axis=-1, keepdims=True)
    y = xc * jax.lax.rsqrt(var + LN_EPS)
    y = y * g_ref[...] + beta_ref[...]
    # one matmul for [linear_a | linear_b]  -> lane-dense [BR, 2*c_h] store
    ab = jnp.dot(y, w_ref[...], preferred_element_type=jnp.float32) + b_ref[...]
    ab = ab * mask_ref[...]                                  # mask: [BR, 1]
    ab_ref[...] = ab.astype(ab_ref.dtype)                    # bf16 out


# ----------------------------- kernel 2 (fused) ------------------------------
def _fused_outer_proj_kernel(c_h, a_ref, b_ref, w_ref, bout_ref, inv_ref,
                             o_ref, acc_ref):
    e = pl.program_id(1)                                     # b-channel index

    @pl.when(e == 0)
    def _init():
        acc_ref[...] = jnp.zeros_like(acc_ref)

    a_t = a_ref[...]                                         # [S, TI*c_h] bf16
    b_e = b_ref[0]                                           # [S, N]      bf16

    # Oe[(i_local, c), j] = sum_s a[s, i, c] * b[s, j, e]   (MXU, transposed LHS)
    oe = jax.lax.dot_general(a_t, b_e, (((0,), (0,)), ((), ())),
                             preferred_element_type=jnp.float32)  # [TI*c_h, N]
    oe = oe.astype(jnp.bfloat16)
    w_e = w_ref[0]                                           # [c_h (c), c_z] bf16

    ti = a_t.shape[1] // c_h
    for i in range(ti):                                      # static unroll
        blk = oe[i * c_h:(i + 1) * c_h, :]                   # [c_h, N] sublane slice
        # sum_c blk[c, j] * w_e[c, z]  ->  [N, c_z]
        acc_ref[i] += jax.lax.dot_general(
            blk, w_e, (((0,), (0,)), ((), ())),
            preferred_element_type=jnp.float32)

    @pl.when(e == pl.num_programs(1) - 1)
    def _finalize():
        z = acc_ref[...] + bout_ref[...]                     # [TI, N, c_z] + [1,1,c_z]
        z = z * inv_ref[...]                                 # * [TI, N, 1]
        o_ref[...] = z.astype(o_ref.dtype)


# ----------------------------- tiling helpers --------------------------------
def _pick_row_tile(n_rows, max_tile=512):
    return n_rows if n_rows <= max_tile else max_tile


def _pick_res_tile(N, c_h):
    # a-block minor dim is TI*c_h: must be a multiple of 128 or TI == N.
    if N * c_h <= 2048 or N <= 64:
        return N
    for t in (64, 32, 16, 8):
        if (t * c_h) % 128 == 0 and N % t == 0:
            return t
    return N


# ----------------------------- wrapper ---------------------------------------
def outer_product_mean(m, msa_mask, params, eps=1e-3):
    S, N, c_m = m.shape
    c_h = params["wa"].shape[1]
    c_z = params["wout"].shape[1]
    SN = S * N

    m2 = m.reshape(SN, c_m).astype(jnp.float32)
    mask2 = msa_mask.reshape(SN, 1).astype(jnp.float32)

    # concatenated projection weights for K1
    w_ab = jnp.concatenate([params["wa"], params["wb"]], axis=1)        # [c_m, 2*c_h]
    b_ab = jnp.concatenate([params["ba"], params["bb"]], axis=0)[None]  # [1, 2*c_h]

    # --- K1: LayerNorm + (linear_a | linear_b) + mask  -> bf16 [SN, 2*c_h] ---
    BR = _pick_row_tile(SN)
    ab = pl.pallas_call(
        _ln_ab_kernel,
        out_shape=jax.ShapeDtypeStruct((SN, 2 * c_h), jnp.bfloat16),
        grid=(pl.cdiv(SN, BR),),
        in_specs=[
            pl.BlockSpec((BR, c_m), lambda r: (r, 0)),
            pl.BlockSpec((BR, 1), lambda r: (r, 0)),
            pl.BlockSpec((1, c_m), lambda r: (0, 0)),
            pl.BlockSpec((1, c_m), lambda r: (0, 0)),
            pl.BlockSpec((c_m, 2 * c_h), lambda r: (0, 0)),
            pl.BlockSpec((1, 2 * c_h), lambda r: (0, 0)),
        ],
        out_specs=pl.BlockSpec((BR, 2 * c_h), lambda r: (r, 0)),
        compiler_params=pltpu.CompilerParams(dimension_semantics=("parallel",)),
    )(m2, mask2, params["gamma"][None, :], params["beta"][None, :], w_ab, b_ab)

    # cheap glue (all small, bf16)
    ab3 = ab.reshape(S, N, 2 * c_h)
    a2 = ab3[:, :, :c_h].reshape(S, N * c_h)                 # [S, (i, c)]   bf16
    b_ef = jnp.transpose(ab3[:, :, c_h:], (2, 0, 1))         # [c_h(e), S, N] bf16

    # projection weight regrouped so a fixed e selects contiguous rows:
    #   w_e[e, c, z] = wout[c * c_h + e, z]
    w_e = params["wout"].reshape(c_h, c_h, c_z).transpose(1, 0, 2)
    w_e = w_e.astype(jnp.bfloat16)                           # [c_h(e), c_h(c), c_z]
    bout3 = params["bout"].reshape(1, 1, c_z).astype(jnp.float32)

    # norm[i, j] = sum_s mask[s, i] * mask[s, j]  (tiny, precomputed once)
    maskf = msa_mask.astype(jnp.float32)
    norm = jnp.dot(maskf.T, maskf, precision=jax.lax.Precision.HIGHEST)
    inv_norm3 = (1.0 / (norm + eps))[:, :, None]             # [N, N, 1]

    # --- K2: fused outer product + projection + bias + normalization ---------
    TI = _pick_res_tile(N, c_h)
    out = pl.pallas_call(
        functools.partial(_fused_outer_proj_kernel, c_h),
        out_shape=jax.ShapeDtypeStruct((N, N, c_z), jnp.float32),
        grid=(pl.cdiv(N, TI), c_h),
        in_specs=[
            pl.BlockSpec((S, TI * c_h), lambda i, e: (0, i)),
            pl.BlockSpec((1, S, N), lambda i, e: (e, 0, 0)),
            pl.BlockSpec((1, c_h, c_z), lambda i, e: (e, 0, 0)),
            pl.BlockSpec((1, 1, c_z), lambda i, e: (0, 0, 0)),
            pl.BlockSpec((TI, N, 1), lambda i, e: (i, 0, 0)),
        ],
        out_specs=pl.BlockSpec((TI, N, c_z), lambda i, e: (i, 0, 0)),
        scratch_shapes=[pltpu.VMEM((TI, N, c_z), jnp.float32)],
        compiler_params=pltpu.CompilerParams(
            dimension_semantics=("parallel", "arbitrary")),
    )(a2, b_ef, w_e, bout3, inv_norm3)

    return out


# ----------------------------- reference & setup -----------------------------
def init_params(key, c_m, c_h, c_z):
    ks = jax.random.split(key, 8)
    std_m = 1.0 / np.sqrt(c_m)
    std_h = 1.0 / np.sqrt(c_h * c_h)
    return dict(
        gamma=1.0 + 0.1 * jax.random.normal(ks[0], (c_m,), jnp.float32),
        beta=0.1 * jax.random.normal(ks[1], (c_m,), jnp.float32),
        wa=std_m * jax.random.normal(ks[2], (c_m, c_h), jnp.float32),
        ba=0.1 * jax.random.normal(ks[3], (c_h,), jnp.float32),
        wb=std_m * jax.random.normal(ks[4], (c_m, c_h), jnp.float32),
        bb=0.1 * jax.random.normal(ks[5], (c_h,), jnp.float32),
        wout=std_h * jax.random.normal(ks[6], (c_h * c_h, c_z), jnp.float32),
        bout=0.1 * jax.random.normal(ks[7], (c_z,), jnp.float32),
    )


def reference(m, msa_mask, p, eps=1e-3):
    hi = jax.lax.Precision.HIGHEST
    mask = msa_mask[..., None].astype(m.dtype)
    mu = jnp.mean(m, axis=-1, keepdims=True)
    var = jnp.mean((m - mu) ** 2, axis=-1, keepdims=True)
    y = (m - mu) / jnp.sqrt(var + LN_EPS) * p["gamma"] + p["beta"]
    a = (jnp.dot(y, p["wa"], precision=hi) + p["ba"]) * mask
    b = (jnp.dot(y, p["wb"], precision=hi) + p["bb"]) * mask
    outer = jnp.einsum("sic,sje->ijce", a, b, precision=hi)
    of = outer.reshape(outer.shape[0], outer.shape[1], -1)
    z = jnp.dot(of, p["wout"], precision=hi) + p["bout"]
    norm = jnp.einsum("si,sj->ij", msa_mask, msa_mask, precision=hi)[..., None]
    return z / (norm + eps)


if __name__ == "__main__":
    # small shapes consistent with the module (c_m, c_h, c_z scaled down)
    S, N, c_m, c_h, c_z = 8, 16, 128, 32, 64
    key = jax.random.PRNGKey(0)
    kp, km, kmask = jax.random.split(key, 3)
    params = init_params(kp, c_m, c_h, c_z)
    m = jax.random.normal(km, (S, N, c_m), jnp.float32)
    msa_mask = (jax.random.uniform(kmask, (S, N)) > 0.2).astype(jnp.float32)

    fn = jax.jit(lambda m_, msk_: outer_product_mean(m_, msk_, params))
    out = jax.block_until_ready(fn(m, msa_mask))

    ref = reference(m, msa_mask, params)
    np.testing.assert_allclose(np.asarray(out), np.asarray(ref),
                               rtol=3e-2, atol=3e-2)
    print("KERNEL_OK")
</pallas_src>

<mosaic_0001>
module attributes {stable_mosaic.version = 11 : i64} {
  func.func @_ln_ab_kernel(%arg0: i32, %arg1: memref<128x128xf32, #tpu.memory_space<vmem>>, %arg2: memref<128x1xf32, #tpu.memory_space<vmem>>, %arg3: memref<1x128xf32, #tpu.memory_space<vmem>>, %arg4: memref<1x128xf32, #tpu.memory_space<vmem>>, %arg5: memref<128x64xf32, #tpu.memory_space<vmem>>, %arg6: memref<1x64xf32, #tpu.memory_space<vmem>>, %arg7: memref<128x64xbf16, #tpu.memory_space<vmem>>) attributes {dimension_semantics = [#tpu.dimension_semantics<parallel>], iteration_bounds = array<i64: 1>, scalar_prefetch = 0 : i64, scratch_operands = 0 : i64, tpu.core_type = #tpu.core_type<tc>, window_params = [{transform_indices = @transform_0, window_bounds = array<i64: 128, 128>}, {transform_indices = @transform_1, window_bounds = array<i64: 128, 1>}, {pipeline_mode = #tpu.pipeline_mode<synchronous>, transform_indices = @transform_2, window_bounds = array<i64: 1, 128>}, {pipeline_mode = #tpu.pipeline_mode<synchronous>, transform_indices = @transform_3, window_bounds = array<i64: 1, 128>}, {pipeline_mode = #tpu.pipeline_mode<synchronous>, transform_indices = @transform_4, window_bounds = array<i64: 128, 64>}, {pipeline_mode = #tpu.pipeline_mode<synchronous>, transform_indices = @transform_5, window_bounds = array<i64: 1, 64>}, {transform_indices = @transform_6, window_bounds = array<i64: 128, 64>}]} {
    %c0 = arith.constant 0 : index
    %c0_0 = arith.constant 0 : index
    %0 = vector.load %arg1[%c0, %c0_0] : memref<128x128xf32, #tpu.memory_space<vmem>>, vector<128x128xf32>
    %cst = arith.constant dense<0.000000e+00> : vector<128xf32>
    %1 = vector.multi_reduction <add>, %0, %cst [1] : vector<128x128xf32> to vector<128xf32>
    %2 = vector.shape_cast %1 : vector<128xf32> to vector<128x1xf32>
    %cst_1 = arith.constant 1.280000e+02 : f32
    %3 = vector.broadcast %cst_1 : f32 to vector<128x1xf32>
    %4 = arith.divf %2, %3 : vector<128x1xf32>
    %5 = vector.broadcast %4 : vector<128x1xf32> to vector<128x128xf32>
    %6 = arith.subf %0, %5 : vector<128x128xf32>
    %7 = arith.mulf %6, %6 : vector<128x128xf32>
    %cst_2 = arith.constant dense<0.000000e+00> : vector<128xf32>
    %8 = vector.multi_reduction <add>, %7, %cst_2 [1] : vector<128x128xf32> to vector<128xf32>
    %9 = vector.shape_cast %8 : vector<128xf32> to vector<128x1xf32>
    %cst_3 = arith.constant 1.280000e+02 : f32
    %10 = vector.broadcast %cst_3 : f32 to vector<128x1xf32>
    %11 = arith.divf %9, %10 : vector<128x1xf32>
    %cst_4 = arith.constant 9.99999974E-6 : f32
    %12 = vector.broadcast %cst_4 : f32 to vector<128x1xf32>
    %13 = arith.addf %11, %12 : vector<128x1xf32>
    %14 = math.rsqrt %13 : vector<128x1xf32>
    %15 = vector.broadcast %14 : vector<128x1xf32> to vector<128x128xf32>
    %16 = arith.mulf %6, %15 : vector<128x128xf32>
    %c0_5 = arith.constant 0 : index
    %c0_6 = arith.constant 0 : index
    %17 = vector.load %arg3[%c0_5, %c0_6] : memref<1x128xf32, #tpu.memory_space<vmem>>, vector<1x128xf32>
    %18 = vector.broadcast %17 : vector<1x128xf32> to vector<128x128xf32>
    %19 = arith.mulf %16, %18 : vector<128x128xf32>
    %c0_7 = arith.constant 0 : index
    %c0_8 = arith.constant 0 : index
    %20 = vector.load %arg4[%c0_7, %c0_8] : memref<1x128xf32, #tpu.memory_space<vmem>>, vector<1x128xf32>
    %21 = vector.broadcast %20 : vector<1x128xf32> to vector<128x128xf32>
    %22 = arith.addf %19, %21 : vector<128x128xf32>
    %c0_9 = arith.constant 0 : index
    %c0_10 = arith.constant 0 : index
    %23 = vector.load %arg5[%c0_9, %c0_10] : memref<128x64xf32, #tpu.memory_space<vmem>>, vector<128x64xf32>
    %cst_11 = arith.constant dense<0.000000e+00> : vector<128x64xf32>
    %24 = tpu.matmul %22, %23, %cst_11 {dimension_numbers = #tpu.dot_dimension_numbers<[1], [0], [0], [1], [0, 0, 1, 1], [], []>} : vector<128x128xf32>, vector<128x64xf32>, vector<128x64xf32> -> vector<128x64xf32>
    %c0_12 = arith.constant 0 : index
    %c0_13 = arith.constant 0 : index
    %25 = vector.load %arg6[%c0_12, %c0_13] : memref<1x64xf32, #tpu.memory_space<vmem>>, vector<1x64xf32>
    %26 = vector.broadcast %25 : vector<1x64xf32> to vector<128x64xf32>
    %27 = arith.addf %24, %26 : vector<128x64xf32>
    %c0_14 = arith.constant 0 : index
    %c0_15 = arith.constant 0 : index
    %28 = vector.load %arg2[%c0_14, %c0_15] : memref<128x1xf32, #tpu.memory_space<vmem>>, vector<128x1xf32>
    %29 = vector.broadcast %28 : vector<128x1xf32> to vector<128x64xf32>
    %30 = arith.mulf %27, %29 : vector<128x64xf32>
    %31 = arith.truncf %30 : vector<128x64xf32> to vector<128x64xbf16>
    %c0_16 = arith.constant 0 : index
    %c0_17 = arith.constant 0 : index
    %32 = vector.load %arg7[%c0_16, %c0_17] : memref<128x64xbf16, #tpu.memory_space<vmem>>, vector<128x64xbf16>
    tpu.vector_store %arg7[%c0_16, %c0_17], %31 {strides = array<i32>} : memref<128x64xbf16, #tpu.memory_space<vmem>>, vector<128x64xbf16>,
    return
  }
  func.func @transform_0(%arg0: i32) -> (i32, i32) {
    %c0_i32 = arith.constant 0 : i32
    %c0_i32_0 = arith.constant 0 : i32
    return %arg0, %c0_i32 : i32, i32
  }
  func.func @transform_1(%arg0: i32) -> (i32, i32) {
    %c0_i32 = arith.constant 0 : i32
    %c0_i32_0 = arith.constant 0 : i32
    return %arg0, %c0_i32 : i32, i32
  }
  func.func @transform_2(%arg0: i32) -> (i32, i32) {
    %c0_i32 = arith.constant 0 : i32
    %c0_i32_0 = arith.constant 0 : i32
    %c0_i32_1 = arith.constant 0 : i32
    return %c0_i32, %c0_i32_0 : i32, i32
  }
  func.func @transform_3(%arg0: i32) -> (i32, i32) {
    %c0_i32 = arith.constant 0 : i32
    %c0_i32_0 = arith.constant 0 : i32
    %c0_i32_1 = arith.constant 0 : i32
    return %c0_i32, %c0_i32_0 : i32, i32
  }
  func.func @transform_4(%arg0: i32) -> (i32, i32) {
    %c0_i32 = arith.constant 0 : i32
    %c0_i32_0 = arith.constant 0 : i32
    %c0_i32_1 = arith.constant 0 : i32
    return %c0_i32, %c0_i32_0 : i32, i32
  }
  func.func @transform_5(%arg0: i32) -> (i32, i32) {
    %c0_i32 = arith.constant 0 : i32
    %c0_i32_0 = arith.constant 0 : i32
    %c0_i32_1 = arith.constant 0 : i32
    return %c0_i32, %c0_i32_0 : i32, i32
  }
  func.func @transform_6(%arg0: i32) -> (i32, i32) {
    %c0_i32 = arith.constant 0 : i32
    %c0_i32_0 = arith.constant 0 : i32
    return %arg0, %c0_i32 : i32, i32
  }
}

module attributes {stable_mosaic.version = 11 : i64} {
  func.func @_fused_outer_proj_kernel(%arg0: i32, %arg1: i32, %arg2: memref<8x512xbf16, #tpu.memory_space<vmem>>, %arg3: memref<1x8x16xbf16, #tpu.memory_space<vmem>>, %arg4: memref<1x32x64xbf16, #tpu.memory_space<vmem>>, %arg5: memref<1x1x64xf32, #tpu.memory_space<vmem>>, %arg6: memref<16x16x1xf32, #tpu.memory_space<vmem>>, %arg7: memref<16x16x64xf32, #tpu.memory_space<vmem>>, %arg8: memref<16x16x64xf32, #tpu.memory_space<vmem>>) attributes {dimension_semantics = [#tpu.dimension_semantics<parallel>, #tpu.dimension_semantics<arbitrary>], iteration_bounds = array<i64: 1, 32>, scalar_prefetch = 0 : i64, scratch_operands = 1 : i64, tpu.core_type = #tpu.core_type<tc>, window_params = [{transform_indices = @transform_0, window_bounds = array<i64: 8, 512>}, {transform_indices = @transform_1, window_bounds = array<i64: 1, 8, 16>}, {transform_indices = @transform_2, window_bounds = array<i64: 1, 32, 64>}, {pipeline_mode = #tpu.pipeline_mode<synchronous>, transform_indices = @transform_3, window_bounds = array<i64: 1, 1, 64>}, {transform_indices = @transform_4, window_bounds = array<i64: 16, 16, 1>}, {transform_indices = @transform_5, window_bounds = array<i64: 16, 16, 64>}]} {
    %c0_i32 = arith.constant 0 : i32
    %0 = arith.cmpi eq, %arg1, %c0_i32 : i32
    %1 = arith.extui %0 : i1 to i32
    %c0_i32_0 = arith.constant 0 : i32
    %2 = arith.cmpi ne, %1, %c0_i32_0 : i32
    scf.if %2 {
      %cst_106 = arith.constant 0.000000e+00 : f32
      %141 = vector.broadcast %cst_106 : f32 to vector<16x16x64xf32>
      %c0_107 = arith.constant 0 : index
      %c0_108 = arith.constant 0 : index
      %c0_109 = arith.constant 0 : index
      %142 = vector.load %arg8[%c0_107, %c0_108, %c0_109] : memref<16x16x64xf32, #tpu.memory_space<vmem>>, vector<16x16x64xf32>
      tpu.vector_store %arg8[%c0_107, %c0_108, %c0_109], %141 {strides = array<i32>} : memref<16x16x64xf32, #tpu.memory_space<vmem>>, vector<16x16x64xf32>,
    } else {
    }
    %c0 = arith.constant 0 : index
    %c0_1 = arith.constant 0 : index
    %3 = vector.load %arg2[%c0, %c0_1] : memref<8x512xbf16, #tpu.memory_space<vmem>>, vector<8x512xbf16>
    %c0_2 = arith.constant 0 : index
    %c0_3 = arith.constant 0 : index
    %c0_4 = arith.constant 0 : index
    %4 = vector.load %arg3[%c0_2, %c0_3, %c0_4] : memref<1x8x16xbf16, #tpu.memory_space<vmem>>, vector<1x8x16xbf16>
    %5 = vector.shape_cast %4 : vector<1x8x16xbf16> to vector<8x16xbf16>
    %cst = arith.constant dense<0.000000e+00> : vector<512x16xf32>
    %6 = tpu.matmul %3, %5, %cst {dimension_numbers = #tpu.dot_dimension_numbers<[0], [0], [1], [1], [0, 1, 1, 1], [], []>} : vector<8x512xbf16>, vector<8x16xbf16>, vector<512x16xf32> -> vector<512x16xf32>
    %7 = arith.truncf %6 : vector<512x16xf32> to vector<512x16xbf16>
    %c0_5 = arith.constant 0 : index
    %c0_6 = arith.constant 0 : index
    %c0_7 = arith.constant 0 : index
    %8 = vector.load %arg4[%c0_5, %c0_6, %c0_7] : memref<1x32x64xbf16, #tpu.memory_space<vmem>>, vector<1x32x64xbf16>
    %9 = vector.shape_cast %8 : vector<1x32x64xbf16> to vector<32x64xbf16>
    %10 = vector.extract_strided_slice %7 {offsets = [0, 0], sizes = [32, 16], strides = [1, 1]} : vector<512x16xbf16> to vector<32x16xbf16>
    %c0_8 = arith.constant 0 : index
    %c0_9 = arith.constant 0 : index
    %c0_10 = arith.constant 0 : index
    %11 = vector.load %arg8[%c0_8, %c0_9, %c0_10] : memref<16x16x64xf32, #tpu.memory_space<vmem>>, vector<1x16x64xf32>
    %12 = vector.shape_cast %11 : vector<1x16x64xf32> to vector<16x64xf32>
    %cst_11 = arith.constant dense<0.000000e+00> : vector<16x64xf32>
    %13 = tpu.matmul %10, %9, %cst_11 {dimension_numbers = #tpu.dot_dimension_numbers<[0], [0], [1], [1], [0, 1, 1, 1], [], []>} : vector<32x16xbf16>, vector<32x64xbf16>, vector<16x64xf32> -> vector<16x64xf32>
    %14 = arith.addf %12, %13 : vector<16x64xf32>
    %c0_12 = arith.constant 0 : index
    %c0_13 = arith.constant 0 : index
    %c0_14 = arith.constant 0 : index
    %15 = vector.load %arg8[%c0_12, %c0_13, %c0_14] : memref<16x16x64xf32, #tpu.memory_space<vmem>>, vector<1x16x64xf32>
    %16 = vector.shape_cast %15 : vector<1x16x64xf32> to vector<16x64xf32>
    %17 = vector.shape_cast %14 : vector<16x64xf32> to vector<1x16x64xf32>
    tpu.vector_store %arg8[%c0_12, %c0_13, %c0_14], %17 {strides = array<i32>} : memref<16x16x64xf32, #tpu.memory_space<vmem>>, vector<1x16x64xf32>,
    %18 = vector.extract_strided_slice %7 {offsets = [32, 0], sizes = [32, 16], strides = [1, 1]} : vector<512x16xbf16> to vector<32x16xbf16>
    %c1 = arith.constant 1 : index
    %c0_15 = arith.constant 0 : index
    %c0_16 = arith.constant 0 : index
    %19 = vector.load %arg8[%c1, %c0_15, %c0_16] : memref<16x16x64xf32, #tpu.memory_space<vmem>>, vector<1x16x64xf32>
    %20 = vector.shape_cast %19 : vector<1x16x64xf32> to vector<16x64xf32>
    %cst_17 = arith.constant dense<0.000000e+00> : vector<16x64xf32>
    %21 = tpu.matmul %18, %9, %cst_17 {dimension_numbers = #tpu.dot_dimension_numbers<[0], [0], [1], [1], [0, 1, 1, 1], [], []>} : vector<32x16xbf16>, vector<32x64xbf16>, vector<16x64xf32> -> vector<16x64xf32>
    %22 = arith.addf %20, %21 : vector<16x64xf32>
    %c1_18 = arith.constant 1 : index
    %c0_19 = arith.constant 0 : index
    %c0_20 = arith.constant 0 : index
    %23 = vector.load %arg8[%c1_18, %c0_19, %c0_20] : memref<16x16x64xf32, #tpu.memory_space<vmem>>, vector<1x16x64xf32>
    %24 = vector.shape_cast %23 : vector<1x16x64xf32> to vector<16x64xf32>
    %25 = vector.shape_cast %22 : vector<16x64xf32> to vector<1x16x64xf32>
    tpu.vector_store %arg8[%c1_18, %c0_19, %c0_20], %25 {strides = array<i32>} : memref<16x16x64xf32, #tpu.memory_space<vmem>>, vector<1x16x64xf32>,
    %26 = vector.extract_strided_slice %7 {offsets = [64, 0], sizes = [32, 16], strides = [1, 1]} : vector<512x16xbf16> to vector<32x16xbf16>
    %c2 = arith.constant 2 : index
    %c0_21 = arith.constant 0 : index
    %c0_22 = arith.constant 0 : index
    %27 = vector.load %arg8[%c2, %c0_21, %c0_22] : memref<16x16x64xf32, #tpu.memory_space<vmem>>, vector<1x16x64xf32>
    %28 = vector.shape_cast %27 : vector<1x16x64xf32> to vector<16x64xf32>
    %cst_23 = arith.constant dense<0.000000e+00> : vector<16x64xf32>
    %29 = tpu.matmul %26, %9, %cst_23 {dimension_numbers = #tpu.dot_dimension_numbers<[0], [0], [1], [1], [0, 1, 1, 1], [], []>} : vector<32x16xbf16>, vector<32x64xbf16>, vector<16x64xf32> -> vector<16x64xf32>
    %30 = arith.addf %28, %29 : vector<16x64xf32>
    %c2_24 = arith.constant 2 : index
    %c0_25 = arith.constant 0 : index
    %c0_26 = arith.constant 0 : index
    %31 = vector.load %arg8[%c2_24, %c0_25, %c0_26] : memref<16x16x64xf32, #tpu.memory_space<vmem>>, vector<1x16x64xf32>
    %32 = vector.shape_cast %31 : vector<1x16x64xf32> to vector<16x64xf32>
    %33 = vector.shape_cast %30 : vector<16x64xf32> to vector<1x16x64xf32>
    tpu.vector_store %arg8[%c2_24, %c0_25, %c0_26], %33 {strides = array<i32>} : memref<16x16x64xf32, #tpu.memory_space<vmem>>, vector<1x16x64xf32>,
    %34 = vector.extract_strided_slice %7 {offsets = [96, 0], sizes = [32, 16], strides = [1, 1]} : vector<512x16xbf16> to vector<32x16xbf16>
    %c3 = arith.constant 3 : index
    %c0_27 = arith.constant 0 : index
    %c0_28 = arith.constant 0 : index
    %35 = vector.load %arg8[%c3, %c0_27, %c0_28] : memref<16x16x64xf32, #tpu.memory_space<vmem>>, vector<1x16x64xf32>
    %36 = vector.shape_cast %35 : vector<1x16x64xf32> to vector<16x64xf32>
    %cst_29 = arith.constant dense<0.000000e+00> : vector<16x64xf32>
    %37 = tpu.matmul %34, %9, %cst_29 {dimension_numbers = #tpu.dot_dimension_numbers<[0], [0], [1], [1], [0, 1, 1, 1], [], []>} : vector<32x16xbf16>, vector<32x64xbf16>, vector<16x64xf32> -> vector<16x64xf32>
    %38 = arith.addf %36, %37 : vector<16x64xf32>
    %c3_30 = arith.constant 3 : index
    %c0_31 = arith.constant 0 : index
    %c0_32 = arith.constant 0 : index
    %39 = vector.load %arg8[%c3_30, %c0_31, %c0_32] : memref<16x16x64xf32, #tpu.memory_space<vmem>>, vector<1x16x64xf32>
    %40 = vector.shape_cast %39 : vector<1x16x64xf32> to vector<16x64xf32>
    %41 = vector.shape_cast %38 : vector<16x64xf32> to vector<1x16x64xf32>
    tpu.vector_store %arg8[%c3_30, %c0_31, %c0_32], %41 {strides = array<i32>} : memref<16x16x64xf32, #tpu.memory_space<vmem>>, vector<1x16x64xf32>,
    %42 = vector.extract_strided_slice %7 {offsets = [128, 0], sizes = [32, 16], strides = [1, 1]} : vector<512x16xbf16> to vector<32x16xbf16>
    %c4 = arith.constant 4 : index
    %c0_33 = arith.constant 0 : index
    %c0_34 = arith.constant 0 : index
    %43 = vector.load %arg8[%c4, %c0_33, %c0_34] : memref<16x16x64xf32, #tpu.memory_space<vmem>>, vector<1x16x64xf32>
    %44 = vector.shape_cast %43 : vector<1x16x64xf32> to vector<16x64xf32>
    %cst_35 = arith.constant dense<0.000000e+00> : vector<16x64xf32>
    %45 = tpu.matmul %42, %9, %cst_35 {dimension_numbers = #tpu.dot_dimension_numbers<[0], [0], [1], [1], [0, 1, 1, 1], [], []>} : vector<32x16xbf16>, vector<32x64xbf16>, vector<16x64xf32> -> vector<16x64xf32>
    %46 = arith.addf %44, %45 : vector<16x64xf32>
    %c4_36 = arith.constant 4 : index
    %c0_37 = arith.constant 0 : index
    %c0_38 = arith.constant 0 : index
    %47 = vector.load %arg8[%c4_36, %c0_37, %c0_38] : memref<16x16x64xf32, #tpu.memory_space<vmem>>, vector<1x16x64xf32>
    %48 = vector.shape_cast %47 : vector<1x16x64xf32> to vector<16x64xf32>
    %49 = vector.shape_cast %46 : vector<16x64xf32> to vector<1x16x64xf32>
    tpu.vector_store %arg8[%c4_36, %c0_37, %c0_38], %49 {strides = array<i32>} : memref<16x16x64xf32, #tpu.memory_space<vmem>>, vector<1x16x64xf32>,
    %50 = vector.extract_strided_slice %7 {offsets = [160, 0], sizes = [32, 16], strides = [1, 1]} : vector<512x16xbf16> to vector<32x16xbf16>
    %c5 = arith.constant 5 : index
    %c0_39 = arith.constant 0 : index
    %c0_40 = arith.constant 0 : index
    %51 = vector.load %arg8[%c5, %c0_39, %c0_40] : memref<16x16x64xf32, #tpu.memory_space<vmem>>, vector<1x16x64xf32>
    %52 = vector.shape_cast %51 : vector<1x16x64xf32> to vector<16x64xf32>
    %cst_41 = arith.constant dense<0.000000e+00> : vector<16x64xf32>
    %53 = tpu.matmul %50, %9, %cst_41 {dimension_numbers = #tpu.dot_dimension_numbers<[0], [0], [1], [1], [0, 1, 1, 1], [], []>} : vector<32x16xbf16>, vector<32x64xbf16>, vector<16x64xf32> -> vector<16x64xf32>
    %54 = arith.addf %52, %53 : vector<16x64xf32>
    %c5_42 = arith.constant 5 : index
    %c0_43 = arith.constant 0 : index
    %c0_44 = arith.constant 0 : index
    %55 = vector.load %arg8[%c5_42, %c0_43, %c0_44] : memref<16x16x64xf32, #tpu.memory_space<vmem>>, vector<1x16x64xf32>
    %56 = vector.shape_cast %55 : vector<1x16x64xf32> to vector<16x64xf32>
    %57 = vector.shape_cast %54 : vector<16x64xf32> to vector<1x16x64xf32>
    tpu.vector_store %arg8[%c5_42, %c0_43, %c0_44], %57 {strides = array<i32>} : memref<16x16x64xf32, #tpu.memory_space<vmem>>, vector<1x16x64xf32>,
    %58 = vector.extract_strided_slice %7 {offsets = [192, 0], sizes = [32, 16], strides = [1, 1]} : vector<512x16xbf16> to vector<32x16xbf16>
    %c6 = arith.constant 6 : index
    %c0_45 = arith.constant 0 : index
    %c0_46 = arith.constant 0 : index
    %59 = vector.load %arg8[%c6, %c0_45, %c0_46] : memref<16x16x64xf32, #tpu.memory_space<vmem>>, vector<1x16x64xf32>
    %60 = vector.shape_cast %59 : vector<1x16x64xf32> to vector<16x64xf32>
    %cst_47 = arith.constant dense<0.000000e+00> : vector<16x64xf32>
    %61 = tpu.matmul %58, %9, %cst_47 {dimension_numbers = #tpu.dot_dimension_numbers<[0], [0], [1], [1], [0, 1, 1, 1], [], []>} : vector<32x16xbf16>, vector<32x64xbf16>, vector<16x64xf32> -> vector<16x64xf32>
    %62 = arith.addf %60, %61 : vector<16x64xf32>
    %c6_48 = arith.constant 6 : index
    %c0_49 = arith.constant 0 : index
    %c0_50 = arith.constant 0 : index
    %63 = vector.load %arg8[%c6_48, %c0_49, %c0_50] : memref<16x16x64xf32, #tpu.memory_space<vmem>>, vector<1x16x64xf32>
    %64 = vector.shape_cast %63 : vector<1x16x64xf32> to vector<16x64xf32>
    %65 = vector.shape_cast %62 : vector<16x64xf32> to vector<1x16x64xf32>
    tpu.vector_store %arg8[%c6_48, %c0_49, %c0_50], %65 {strides = array<i32>} : memref<16x16x64xf32, #tpu.memory_space<vmem>>, vector<1x16x64xf32>,
    %66 = vector.extract_strided_slice %7 {offsets = [224, 0], sizes = [32, 16], strides = [1, 1]} : vector<512x16xbf16> to vector<32x16xbf16>
    %c7 = arith.constant 7 : index
    %c0_51 = arith.constant 0 : index
    %c0_52 = arith.constant 0 : index
    %67 = vector.load %arg8[%c7, %c0_51, %c0_52] : memref<16x16x64xf32, #tpu.memory_space<vmem>>, vector<1x16x64xf32>
    %68 = vector.shape_cast %67 : vector<1x16x64xf32> to vector<16x64xf32>
    %cst_53 = arith.constant dense<0.000000e+00> : vector<16x64xf32>
    %69 = tpu.matmul %66, %9, %cst_53 {dimension_numbers = #tpu.dot_dimension_numbers<[0], [0], [1], [1], [0, 1, 1, 1], [], []>} : vector<32x16xbf16>, vector<32x64xbf16>, vector<16x64xf32> -> vector<16x64xf32>
    %70 = arith.addf %68, %69 : vector<16x64xf32>
    %c7_54 = arith.constant 7 : index
    %c0_55 = arith.constant 0 : index
    %c0_56 = arith.constant 0 : index
    %71 = vector.load %arg8[%c7_54, %c0_55, %c0_56] : memref<16x16x64xf32, #tpu.memory_space<vmem>>, vector<1x16x64xf32>
    %72 = vector.shape_cast %71 : vector<1x16x64xf32> to vector<16x64xf32>
    %73 = vector.shape_cast %70 : vector<16x64xf32> to vector<1x16x64xf32>
    tpu.vector_store %arg8[%c7_54, %c0_55, %c0_56], %73 {strides = array<i32>} : memref<16x16x64xf32, #tpu.memory_space<vmem>>, vector<1x16x64xf32>,
    %74 = vector.extract_strided_slice %7 {offsets = [256, 0], sizes = [32, 16], strides = [1, 1]} : vector<512x16xbf16> to vector<32x16xbf16>
    %c8 = arith.constant 8 : index
    %c0_57 = arith.constant 0 : index
    %c0_58 = arith.constant 0 : index
    %75 = vector.load %arg8[%c8, %c0_57, %c0_58] : memref<16x16x64xf32, #tpu.memory_space<vmem>>, vector<1x16x64xf32>
    %76 = vector.shape_cast %75 : vector<1x16x64xf32> to vector<16x64xf32>
    %cst_59 = arith.constant dense<0.000000e+00> : vector<16x64xf32>
    %77 = tpu.matmul %74, %9, %cst_59 {dimension_numbers = #tpu.dot_dimension_numbers<[0], [0], [1], [1], [0, 1, 1, 1], [], []>} : vector<32x16xbf16>, vector<32x64xbf16>, vector<16x64xf32> -> vector<16x64xf32>
    %78 = arith.addf %76, %77 : vector<16x64xf32>
    %c8_60 = arith.constant 8 : index
    %c0_61 = arith.constant 0 : index
    %c0_62 = arith.constant 0 : index
    %79 = vector.load %arg8[%c8_60, %c0_61, %c0_62] : memref<16x16x64xf32, #tpu.memory_space<vmem>>, vector<1x16x64xf32>
    %80 = vector.shape_cast %79 : vector<1x16x64xf32> to vector<16x64xf32>
    %81 = vector.shape_cast %78 : vector<16x64xf32> to vector<1x16x64xf32>
    tpu.vector_store %arg8[%c8_60, %c0_61, %c0_62], %81 {strides = array<i32>} : memref<16x16x64xf32, #tpu.memory_space<vmem>>, vector<1x16x64xf32>,
    %82 = vector.extract_strided_slice %7 {offsets = [288, 0], sizes = [32, 16], strides = [1, 1]} : vector<512x16xbf16> to vector<32x16xbf16>
    %c9 = arith.constant 9 : index
    %c0_63 = arith.constant 0 : index
    %c0_64 = arith.constant 0 : index
    %83 = vector.load %arg8[%c9, %c0_63, %c0_64] : memref<16x16x64xf32, #tpu.memory_space<vmem>>, vector<1x16x64xf32>
    %84 = vector.shape_cast %83 : vector<1x16x64xf32> to vector<16x64xf32>
    %cst_65 = arith.constant dense<0.000000e+00> : vector<16x64xf32>
    %85 = tpu.matmul %82, %9, %cst_65 {dimension_numbers = #tpu.dot_dimension_numbers<[0], [0], [1], [1], [0, 1, 1, 1], [], []>} : vector<32x16xbf16>, vector<32x64xbf16>, vector<16x64xf32> -> vector<16x64xf32>
    %86 = arith.addf %84, %85 : vector<16x64xf32>
    %c9_66 = arith.constant 9 : index
    %c0_67 = arith.constant 0 : index
    %c0_68 = arith.constant 0 : index
    %87 = vector.load %arg8[%c9_66, %c0_67, %c0_68] : memref<16x16x64xf32, #tpu.memory_space<vmem>>, vector<1x16x64xf32>
    %88 = vector.shape_cast %87 : vector<1x16x64xf32> to vector<16x64xf32>
    %89 = vector.shape_cast %86 : vector<16x64xf32> to vector<1x16x64xf32>
    tpu.vector_store %arg8[%c9_66, %c0_67, %c0_68], %89 {strides = array<i32>} : memref<16x16x64xf32, #tpu.memory_space<vmem>>, vector<1x16x64xf32>,
    %90 = vector.extract_strided_slice %7 {offsets = [320, 0], sizes = [32, 16], strides = [1, 1]} : vector<512x16xbf16> to vector<32x16xbf16>
    %c10 = arith.constant 10 : index
    %c0_69 = arith.constant 0 : index
    %c0_70 = arith.constant 0 : index
    %91 = vector.load %arg8[%c10, %c0_69, %c0_70] : memref<16x16x64xf32, #tpu.memory_space<vmem>>, vector<1x16x64xf32>
    %92 = vector.shape_cast %91 : vector<1x16x64xf32> to vector<16x64xf32>
    %cst_71 = arith.constant dense<0.000000e+00> : vector<16x64xf32>
    %93 = tpu.matmul %90, %9, %cst_71 {dimension_numbers = #tpu.dot_dimension_numbers<[0], [0], [1], [1], [0, 1, 1, 1], [], []>} : vector<32x16xbf16>, vector<32x64xbf16>, vector<16x64xf32> -> vector<16x64xf32>
    %94 = arith.addf %92, %93 : vector<16x64xf32>
    %c10_72 = arith.constant 10 : index
    %c0_73 = arith.constant 0 : index
    %c0_74 = arith.constant 0 : index
    %95 = vector.load %arg8[%c10_72, %c0_73, %c0_74] : memref<16x16x64xf32, #tpu.memory_space<vmem>>, vector<1x16x64xf32>
    %96 = vector.shape_cast %95 : vector<1x16x64xf32> to vector<16x64xf32>
    %97 = vector.shape_cast %94 : vector<16x64xf32> to vector<1x16x64xf32>
    tpu.vector_store %arg8[%c10_72, %c0_73, %c0_74], %97 {strides = array<i32>} : memref<16x16x64xf32, #tpu.memory_space<vmem>>, vector<1x16x64xf32>,
    %98 = vector.extract_strided_slice %7 {offsets = [352, 0], sizes = [32, 16], strides = [1, 1]} : vector<512x16xbf16> to vector<32x16xbf16>
    %c11 = arith.constant 11 : index
    %c0_75 = arith.constant 0 : index
    %c0_76 = arith.constant 0 : index
    %99 = vector.load %arg8[%c11, %c0_75, %c0_76] : memref<16x16x64xf32, #tpu.memory_space<vmem>>, vector<1x16x64xf32>
    %100 = vector.shape_cast %99 : vector<1x16x64xf32> to vector<16x64xf32>
    %cst_77 = arith.constant dense<0.000000e+00> : vector<16x64xf32>
    %101 = tpu.matmul %98, %9, %cst_77 {dimension_numbers = #tpu.dot_dimension_numbers<[0], [0], [1], [1], [0, 1, 1, 1], [], []>} : vector<32x16xbf16>, vector<32x64xbf16>, vector<16x64xf32> -> vector<16x64xf32>
    %102 = arith.addf %100, %101 : vector<16x64xf32>
    %c11_78 = arith.constant 11 : index
    %c0_79 = arith.constant 0 : index
    %c0_80 = arith.constant 0 : index
    %103 = vector.load %arg8[%c11_78, %c0_79, %c0_80] : memref<16x16x64xf32, #tpu.memory_space<vmem>>, vector<1x16x64xf32>
    %104 = vector.shape_cast %103 : vector<1x16x64xf32> to vector<16x64xf32>
    %105 = vector.shape_cast %102 : vector<16x64xf32> to vector<1x16x64xf32>
    tpu.vector_store %arg8[%c11_78, %c0_79, %c0_80], %105 {strides = array<i32>} : memref<16x16x64xf32, #tpu.memory_space<vmem>>, vector<1x16x64xf32>,
    %106 = vector.extract_strided_slice %7 {offsets = [384, 0], sizes = [32, 16], strides = [1, 1]} : vector<512x16xbf16> to vector<32x16xbf16>
    %c12 = arith.constant 12 : index
    %c0_81 = arith.constant 0 : index
    %c0_82 = arith.constant 0 : index
    %107 = vector.load %arg8[%c12, %c0_81, %c0_82] : memref<16x16x64xf32, #tpu.memory_space<vmem>>, vector<1x16x64xf32>
    %108 = vector.shape_cast %107 : vector<1x16x64xf32> to vector<16x64xf32>
    %cst_83 = arith.constant dense<0.000000e+00> : vector<16x64xf32>
    %109 = tpu.matmul %106, %9, %cst_83 {dimension_numbers = #tpu.dot_dimension_numbers<[0], [0], [1], [1], [0, 1, 1, 1], [], []>} : vector<32x16xbf16>, vector<32x64xbf16>, vector<16x64xf32> -> vector<16x64xf32>
    %110 = arith.addf %108, %109 : vector<16x64xf32>
    %c12_84 = arith.constant 12 : index
    %c0_85 = arith.constant 0 : index
    %c0_86 = arith.constant 0 : index
    %111 = vector.load %arg8[%c12_84, %c0_85, %c0_86] : memref<16x16x64xf32, #tpu.memory_space<vmem>>, vector<1x16x64xf32>
    %112 = vector.shape_cast %111 : vector<1x16x64xf32> to vector<16x64xf32>
    %113 = vector.shape_cast %110 : vector<16x64xf32> to vector<1x16x64xf32>
    tpu.vector_store %arg8[%c12_84, %c0_85, %c0_86], %113 {strides = array<i32>} : memref<16x16x64xf32, #tpu.memory_space<vmem>>, vector<1x16x64xf32>,
    %114 = vector.extract_strided_slice %7 {offsets = [416, 0], sizes = [32, 16], strides = [1, 1]} : vector<512x16xbf16> to vector<32x16xbf16>
    %c13 = arith.constant 13 : index
    %c0_87 = arith.constant 0 : index
    %c0_88 = arith.constant 0 : index
    %115 = vector.load %arg8[%c13, %c0_87, %c0_88] : memref<16x16x64xf32, #tpu.memory_space<vmem>>, vector<1x16x64xf32>
    %116 = vector.shape_cast %115 : vector<1x16x64xf32> to vector<16x64xf32>
    %cst_89 = arith.constant dense<0.000000e+00> : vector<16x64xf32>
    %117 = tpu.matmul %114, %9, %cst_89 {dimension_numbers = #tpu.dot_dimension_numbers<[0], [0], [1], [1], [0, 1, 1, 1], [], []>} : vector<32x16xbf16>, vector<32x64xbf16>, vector<16x64xf32> -> vector<16x64xf32>
    %118 = arith.addf %116, %117 : vector<16x64xf32>
    %c13_90 = arith.constant 13 : index
    %c0_91 = arith.constant 0 : index
    %c0_92 = arith.constant 0 : index
    %119 = vector.load %arg8[%c13_90, %c0_91, %c0_92] : memref<16x16x64xf32, #tpu.memory_space<vmem>>, vector<1x16x64xf32>
    %120 = vector.shape_cast %119 : vector<1x16x64xf32> to vector<16x64xf32>
    %121 = vector.shape_cast %118 : vector<16x64xf32> to vector<1x16x64xf32>
    tpu.vector_store %arg8[%c13_90, %c0_91, %c0_92], %121 {strides = array<i32>} : memref<16x16x64xf32, #tpu.memory_space<vmem>>, vector<1x16x64xf32>,
    %122 = vector.extract_strided_slice %7 {offsets = [448, 0], sizes = [32, 16], strides = [1, 1]} : vector<512x16xbf16> to vector<32x16xbf16>
    %c14 = arith.constant 14 : index
    %c0_93 = arith.constant 0 : index
    %c0_94 = arith.constant 0 : index
    %123 = vector.load %arg8[%c14, %c0_93, %c0_94] : memref<16x16x64xf32, #tpu.memory_space<vmem>>, vector<1x16x64xf32>
    %124 = vector.shape_cast %123 : vector<1x16x64xf32> to vector<16x64xf32>
    %cst_95 = arith.constant dense<0.000000e+00> : vector<16x64xf32>
    %125 = tpu.matmul %122, %9, %cst_95 {dimension_numbers = #tpu.dot_dimension_numbers<[0], [0], [1], [1], [0, 1, 1, 1], [], []>} : vector<32x16xbf16>, vector<32x64xbf16>, vector<16x64xf32> -> vector<16x64xf32>
    %126 = arith.addf %124, %125 : vector<16x64xf32>
    %c14_96 = arith.constant 14 : index
    %c0_97 = arith.constant 0 : index
    %c0_98 = arith.constant 0 : index
    %127 = vector.load %arg8[%c14_96, %c0_97, %c0_98] : memref<16x16x64xf32, #tpu.memory_space<vmem>>, vector<1x16x64xf32>
    %128 = vector.shape_cast %127 : vector<1x16x64xf32> to vector<16x64xf32>
    %129 = vector.shape_cast %126 : vector<16x64xf32> to vector<1x16x64xf32>
    tpu.vector_store %arg8[%c14_96, %c0_97, %c0_98], %129 {strides = array<i32>} : memref<16x16x64xf32, #tpu.memory_space<vmem>>, vector<1x16x64xf32>,
    %130 = vector.extract_strided_slice %7 {offsets = [480, 0], sizes = [32, 16], strides = [1, 1]} : vector<512x16xbf16> to vector<32x16xbf16>
    %c15 = arith.constant 15 : index
    %c0_99 = arith.constant 0 : index
    %c0_100 = arith.constant 0 : index
    %131 = vector.load %arg8[%c15, %c0_99, %c0_100] : memref<16x16x64xf32, #tpu.memory_space<vmem>>, vector<1x16x64xf32>
    %132 = vector.shape_cast %131 : vector<1x16x64xf32> to vector<16x64xf32>
    %cst_101 = arith.constant dense<0.000000e+00> : vector<16x64xf32>
    %133 = tpu.matmul %130, %9, %cst_101 {dimension_numbers = #tpu.dot_dimension_numbers<[0], [0], [1], [1], [0, 1, 1, 1], [], []>} : vector<32x16xbf16>, vector<32x64xbf16>, vector<16x64xf32> -> vector<16x64xf32>
    %134 = arith.addf %132, %133 : vector<16x64xf32>
    %c15_102 = arith.constant 15 : index
    %c0_103 = arith.constant 0 : index
    %c0_104 = arith.constant 0 : index
    %135 = vector.load %arg8[%c15_102, %c0_103, %c0_104] : memref<16x16x64xf32, #tpu.memory_space<vmem>>, vector<1x16x64xf32>
    %136 = vector.shape_cast %135 : vector<1x16x64xf32> to vector<16x64xf32>
    %137 = vector.shape_cast %134 : vector<16x64xf32> to vector<1x16x64xf32>
    tpu.vector_store %arg8[%c15_102, %c0_103, %c0_104], %137 {strides = array<i32>} : memref<16x16x64xf32, #tpu.memory_space<vmem>>, vector<1x16x64xf32>,
    %c31_i32 = arith.constant 31 : i32
    %138 = arith.cmpi eq, %arg1, %c31_i32 : i32
    %139 = arith.extui %138 : i1 to i32
    %c0_i32_105 = arith.constant 0 : i32
    %140 = arith.cmpi ne, %139, %c0_i32_105 : i32
    scf.if %140 {
      %c0_106 = arith.constant 0 : index
      %c0_107 = arith.constant 0 : index
      %c0_108 = arith.constant 0 : index
      %141 = vector.load %arg8[%c0_106, %c0_107, %c0_108] : memref<16x16x64xf32, #tpu.memory_space<vmem>>, vector<16x16x64xf32>
      %c0_109 = arith.constant 0 : index
      %c0_110 = arith.constant 0 : index
      %c0_111 = arith.constant 0 : index
      %142 = vector.load %arg5[%c0_109, %c0_110, %c0_111] : memref<1x1x64xf32, #tpu.memory_space<vmem>>, vector<1x1x64xf32>
      %143 = vector.broadcast %142 : vector<1x1x64xf32> to vector<16x16x64xf32>
      %144 = arith.addf %141, %143 : vector<16x16x64xf32>
      %c0_112 = arith.constant 0 : index
      %c0_113 = arith.constant 0 : index
      %c0_114 = arith.constant 0 : index
      %145 = vector.load %arg6[%c0_112, %c0_113, %c0_114] : memref<16x16x1xf32, #tpu.memory_space<vmem>>, vector<16x16x1xf32>
      %146 = vector.broadcast %145 : vector<16x16x1xf32> to vector<16x16x64xf32>
      %147 = arith.mulf %144, %146 : vector<16x16x64xf32>
      %c0_115 = arith.constant 0 : index
      %c0_116 = arith.constant 0 : index
      %c0_117 = arith.constant 0 : index
      %148 = vector.load %arg7[%c0_115, %c0_116, %c0_117] : memref<16x16x64xf32, #tpu.memory_space<vmem>>, vector<16x16x64xf32>
      tpu.vector_store %arg7[%c0_115, %c0_116, %c0_117], %147 {strides = array<i32>} : memref<16x16x64xf32, #tpu.memory_space<vmem>>, vector<16x16x64xf32>,
    } else {
    }
    return
  }
  func.func @transform_0(%arg0: i32, %arg1: i32) -> (i32, i32) {
    %c0_i32 = arith.constant 0 : i32
    %c0_i32_0 = arith.constant 0 : i32
    return %c0_i32, %arg0 : i32, i32
  }
  func.func @transform_1(%arg0: i32, %arg1: i32) -> (i32, i32, i32) {
    %c0_i32 = arith.constant 0 : i32
    %c0_i32_0 = arith.constant 0 : i32
    %c0_i32_1 = arith.constant 0 : i32
    return %arg1, %c0_i32, %c0_i32_0 : i32, i32, i32
  }
  func.func @transform_2(%arg0: i32, %arg1: i32) -> (i32, i32, i32) {
    %c0_i32 = arith.constant 0 : i32
    %c0_i32_0 = arith.constant 0 : i32
    %c0_i32_1 = arith.constant 0 : i32
    return %arg1, %c0_i32, %c0_i32_0 : i32, i32, i32
  }
  func.func @transform_3(%arg0: i32, %arg1: i32) -> (i32, i32, i32) {
    %c0_i32 = arith.constant 0 : i32
    %c0_i32_0 = arith.constant 0 : i32
    %c0_i32_1 = arith.constant 0 : i32
    %c0_i32_2 = arith.constant 0 : i32
    return %c0_i32, %c0_i32_0, %c0_i32_1 : i32, i32, i32
  }
  func.func @transform_4(%arg0: i32, %arg1: i32) -> (i32, i32, i32) {
    %c0_i32 = arith.constant 0 : i32
    %c0_i32_0 = arith.constant 0 : i32
    %c0_i32_1 = arith.constant 0 : i32
    return %arg0, %c0_i32, %c0_i32_0 : i32, i32, i32
  }
  func.func @transform_5(%arg0: i32, %arg1: i32) -> (i32, i32, i32) {
    %c0_i32 = arith.constant 0 : i32
    %c0_i32_0 = arith.constant 0 : i32
    %c0_i32_1 = arith.constant 0 : i32
    return %arg0, %c0_i32, %c0_i32_0 : i32, i32, i32
  }
}

</mosaic_0001>

<bundles_post_ra>
// kernel: _lambda_.2
= control target key start
LH: loop header
LB: loop body
LE: loop exit
PB: predicated region body
PF: predicated region fallthrough
CT: control target
= control target key end

     0   :  { %11 = vsyncpa [#allocation3], 0  ;;  %s875_s21 = smov [#allocation2]   ;;  %s1275_s0 = inlined_call_operand.vmem [shape: f32[128,128], index: 0, kind: input, shape index: {}]   ;;  %s1276_s1 = inlined_call_operand.vmem [shape: f32[128,1], index: 1, kind: input, shape index: {}]   ;;  %s1277_s2 = inlined_call_operand.vmem [shape: f32[1,128], index: 2, kind: input, shape index: {}]   ;;  %s1278_s3 = inlined_call_operand.vmem [shape: f32[1,128], index: 3, kind: input, shape index: {}]   ;;  %s1279_s4 = inlined_call_operand.hbm [shape: f32[128,64], index: 4, kind: input, shape index: {}]   ;;  %s1280_s5 = inlined_call_operand.vmem [shape: f32[1,64], index: 5, kind: input, shape index: {}]   ;;  %s1281_s6 = inlined_call_operand.vmem [shape: bf16[128,64], index: 6, kind: output, shape index: {}]  }
   0x1   :  { %s25_s22 = sshll.u32 %s875_s21, 4  ;;  %s851_s25 = scalar_lea.hbm %s1279_s4, 2048  ;;  %s26_s22 = int_to_ptr.vmem [resolvable:$true] %s25_s22 }
   0x2   :  { %p852_p0 = scmp.ne.s32.totalorder %s1279_s4, %s851_s25  ;;  %p855_p1 = scmp.lt.u32.totalorder %s851_s25, %s1279_s4 }
   0x4   :  { %p857_p2 = pnand %p855_p1, %p852_p0 }
   0x6   :  { %860 = shalt.err (!%p857_p2)
}
   0x7   :  { %s861_s30 = scalar_lea.vmem %s26_s22, 2048  ;;  %p866_p4 = scmp.lt.s32.totalorder %s26_s22, %s26_s22 }
   0x8   :  { %p862_p3 = scmp.ne.s32.totalorder %s26_s22, %s861_s30  ;;  %p867_p5 = scmp.lt.s32.totalorder %s861_s30, %s861_s30 }
   0xa   :  { %p868_p6 = por %p867_p5, %p866_p4 }
   0xc   :  { %p869_p7 = pnand %p868_p6, %p862_p3 }
   0xe   :  { %872 = shalt.err (!%p869_p7)
}
   0xf   :  { %s876_s7 = smov 128   ;;  %s877_s8 = smov 8  }
  0x10   :  { %31 = dma.hbm_to_vmem [thread:$0]  %s1279_s4, 2048, %s26_s22, [#allocation3], %s876_s7, %s876_s7, %s877_s8  }
  0x11   :  { %873 = dma.done.wait [#allocation3], 2048  }
  0x12   :  { %874 = vsyncadd [#allocation3], 4294965248  ;;  %v37_v0 = vld [vmem:[%s1275_s0] sm:$0xff]  ;;  %v38_v1 = vld [vmem:[%s1275_s0 + $0x8] sm:$0xff]  ;;  %vm620_vm0 = vcmask 519168  }
  0x13   :  { %53 = vadd.xlane.f32.xlu0 %v37_v0  ;;  %55 = vadd.xlane.f32.xlu1 %v38_v1  ;;  %v45_v2 = vld [vmem:[%s1275_s0 + $0x40] sm:$0xff]  ;;  %v46_v3 = vld [vmem:[%s1275_s0 + $0x48] sm:$0xff]  ;;  %v39_v4 = vld [vmem:[%s1275_s0 + $0x10] sm:$0xff] }
  0x14   :  { %v47_v5 = vld [vmem:[%s1275_s0 + $0x50] sm:$0xff]  ;;  %v947_v6 = vld [vmem:[%s1275_s0 + $0x18] sm:$0xff]  ;;  %v959_v8 = vld [vmem:[%s1275_s0 + $0x20] sm:$0xff] }
  0x15   :  { %v952_v7 = vld [vmem:[%s1275_s0 + $0x58] sm:$0xff]  ;;  %v964_v9 = vld [vmem:[%s1275_s0 + $0x60] sm:$0xff]  ;;  %v971_v10 = vld [vmem:[%s1275_s0 + $0x28] sm:$0xff] }
  0x16   :  { %v976_v11 = vld [vmem:[%s1275_s0 + $0x68] sm:$0xff]  ;;  %v983_v12 = vld [vmem:[%s1275_s0 + $0x30] sm:$0xff]  ;;  %v995_v14 = vld [vmem:[%s1275_s0 + $0x38] sm:$0xff] }
  0x17   :  { %69 = vadd.xlane.f32.xlu0 %v45_v2  ;;  %71 = vadd.xlane.f32.xlu1 %v46_v3  ;;  %v988_v13 = vld [vmem:[%s1275_s0 + $0x70] sm:$0xff]  ;;  %v1000_v15 = vld [vmem:[%s1275_s0 + $0x78] sm:$0xff]  ;;  %v276_v16 = vld [vmem:[#allocation2] sm:$0xff] }
  0x18   :  { %v277_v17 = vld [vmem:[#allocation2 + $0x8] sm:$0xff]  ;;  %v278_v18 = vld [vmem:[#allocation2 + $0x10] sm:$0xff]  ;;  %v279_v20 = vld [vmem:[#allocation2 + $0x18] sm:$0xff] }
  0x19   :  { %v765_v19 = vpack.c.bf16 %v277_v17, %v276_v16  ;;  %v769_v21 = vpack.c.bf16 %v279_v20, %v278_v18  ;;  %v280_v60 = vld [vmem:[#allocation2 + $0x20] sm:$0xff]  ;;  %v281_v61 = vld [vmem:[#allocation2 + $0x28] sm:$0xff]  ;;  %v283_v16 = vld [vmem:[#allocation2 + $0x38] sm:$0xff] }
  0x1b   :  { %57 = vadd.xlane.f32.xlu0 %v39_v4  ;;  %73 = vadd.xlane.f32.xlu1 %v47_v5 }
  0x1c   :  { %766 = vmatprep.subr.bf16.mxu0 %v765_v19  ;;  %797 = vmatprep.subr.bf16.mxu1 %v765_v19 }
  0x1d   :  { %768 = vmatpush3.bf16.msra.mxu0 %v765_v19  ;;  %805 = vmatpush3.bf16.msra.mxu1 %v765_v19 }
  0x1e   :  { %770 = vmatprep.subr.bf16.mxu0 %v769_v21  ;;  %798 = vmatprep.subr.bf16.mxu1 %v769_v21 }
  0x1f   :  { %59 = vadd.xlane.f32.xlu0 %v947_v6  ;;  %75 = vadd.xlane.f32.xlu1 %v952_v7 }
  0x21   :  { %772 = vmatpush3.bf16.msra.mxu0 %v769_v21  ;;  %806 = vmatpush3.bf16.msra.mxu1 %v769_v21 }
  0x23   :  { %61 = vadd.xlane.f32.xlu0 %v959_v8  ;;  %77 = vadd.xlane.f32.xlu1 %v964_v9 }
  0x27   :  { %63 = vadd.xlane.f32.xlu0 %v971_v10  ;;  %79 = vadd.xlane.f32.xlu1 %v976_v11 }
  0x2b   :  { %65 = vadd.xlane.f32.xlu0 %v983_v12  ;;  %81 = vadd.xlane.f32.xlu1 %v988_v13 }
  0x2f   :  { %67 = vadd.xlane.f32.xlu0 %v995_v14  ;;  %83 = vadd.xlane.f32.xlu1 %v1000_v15 }
  0xa0   :  { %v54_v22 = vpop.xlane.xlu0 %53  ;;  %v56_v23 = vpop.xlane.xlu1 %55 }
  0xa1   :  { %v86_v24 = vmul.f32 0.0078125, %v54_v22  ;;  %v87_v25 = vmul.f32 0.0078125, %v56_v23 }
  0xa3   :  { %v1004_v26 = vsub.f32 %v37_v0, %v86_v24  ;;  %v1006_v27 = vsub.f32 %v38_v1, %v87_v25  ;;  %v773_v0 = vpack.c.bf16 %v281_v61, %v280_v60  ;;  %v284_v24 = vld [vmem:[#allocation2 + $0x40] sm:$0xff]  ;;  %v285_v25 = vld [vmem:[#allocation2 + $0x48] sm:$0xff]  ;;  %v459_v60 = vld [vmem:[%s1276_s1 + $0x78] sm:$0xff] }
  0xa4   :  { %v70_v28 = vpop.xlane.xlu0 %69  ;;  %v72_v29 = vpop.xlane.xlu1 %71  ;;  %v450_v61 = vld [vmem:[%s1276_s1 + $0x30] sm:$0xff] }
  0xa5   :  { %v94_v30 = vmul.f32 0.0078125, %v70_v28  ;;  %v118_v31 = vmul.f32 %v1004_v26, %v1004_v26  ;;  %v95_v32 = vmul.f32 0.0078125, %v72_v29  ;;  %v119_v35 = vmul.f32 %v1006_v27, %v1006_v27  ;;  %774 = vmatprep.subr.bf16.mxu0 %v773_v0  ;;  %799 = vmatprep.subr.bf16.mxu1 %v773_v0 }
  0xa6   :  { %776 = vmatpush3.bf16.msra.mxu0 %v773_v0  ;;  %807 = vmatpush3.bf16.msra.mxu1 %v773_v0  ;;  %v454_v0 = vld [vmem:[%s1276_s1 + $0x50] sm:$0xff] }
  0xa7   :  { %v1010_v33 = vsub.f32 %v45_v2, %v94_v30  ;;  %134 = vadd.xlane.f32.xlu0 %v118_v31  ;;  %v1012_v34 = vsub.f32 %v46_v3, %v95_v32  ;;  %v781_v30 = vpack.c.bf16 %v285_v25, %v284_v24 }
  0xa8   :  { %v58_v36 = vpop.xlane.xlu0 %57  ;;  %v74_v37 = vpop.xlane.xlu1 %73 }
  0xa9   :  { %v88_v38 = vmul.f32 0.0078125, %v58_v36  ;;  %v126_v39 = vmul.f32 %v1010_v33, %v1010_v33  ;;  %v96_v40 = vmul.f32 0.0078125, %v74_v37  ;;  %v127_v43 = vmul.f32 %v1012_v34, %v1012_v34  ;;  %v287_v36 = vld [vmem:[#allocation2 + $0x58] sm:$0xff] }
  0xab   :  { %v1018_v41 = vsub.f32 %v39_v4, %v88_v38  ;;  %136 = vadd.xlane.f32.xlu0 %v119_v35  ;;  %150 = vadd.xlane.f32.xlu1 %v126_v39  ;;  %v1020_v42 = vsub.f32 %v47_v5, %v96_v40  ;;  %v286_v35 = vld [vmem:[#allocation2 + $0x50] sm:$0xff]  ;;  %v289_v39 = vld [vmem:[#allocation2 + $0x68] sm:$0xff] }
  0xac   :  { %v60_v44 = vpop.xlane.xlu0 %59  ;;  %v76_v45 = vpop.xlane.xlu1 %75  ;;  %v785_v38 = vpack.c.bf16 %v287_v36, %v286_v35 }
  0xad   :  { %v89_v46 = vmul.f32 0.0078125, %v60_v44  ;;  %v120_v47 = vmul.f32 %v1018_v41, %v1018_v41  ;;  %v97_v48 = vmul.f32 0.0078125, %v76_v45  ;;  %v128_v51 = vmul.f32 %v1020_v42, %v1020_v42  ;;  %v291_v44 = vld [vmem:[#allocation2 + $0x78] sm:$0xff] }
  0xaf   :  { %v1027_v49 = vsub.f32 %v947_v6, %v89_v46  ;;  %152 = vadd.xlane.f32.xlu1 %v127_v43  ;;  %138 = vadd.xlane.f32.xlu0 %v120_v47  ;;  %v1030_v50 = vsub.f32 %v952_v7, %v97_v48  ;;  %v290_v43 = vld [vmem:[#allocation2 + $0x70] sm:$0xff]  ;;  %v445_v46 = vld [vmem:[%s1276_s1 + $0x8] sm:$0xff]  ;;  %v878_v47 = vmov 0  }
  0xb0   :  { %v62_v52 = vpop.xlane.xlu0 %61  ;;  %v78_v53 = vpop.xlane.xlu1 %77  ;;  %v793_v45 = vpack.c.bf16 %v291_v44, %v290_v43  ;;  %818 = vset.pattern.permute.xlu1 %v878_v47  ;;  %817 = vset.pattern.permute.xlu0 %v878_v47  ;;  %v446_v48 = vld [vmem:[%s1276_s1 + $0x10] sm:$0xff]  ;;  %v1135_v43 = vld [vmem:[%s1278_s3] ss:$0 sm:$0xff] }
  0xb1   :  { %v90_v54 = vmul.f32 0.0078125, %v62_v52  ;;  %v121_v55 = vmul.f32 %v1027_v49, %v1027_v49  ;;  %v98_v56 = vmul.f32 0.0078125, %v78_v53  ;;  %v129_v59 = vmul.f32 %v1030_v50, %v1030_v50  ;;  %v453_v52 = vld [vmem:[%s1276_s1 + $0x48] sm:$0xff]  ;;  %v447_v53 = vld [vmem:[%s1276_s1 + $0x18] sm:$0xff] }
  0xb3   :  { %v1037_v57 = vsub.f32 %v959_v8, %v90_v54  ;;  %154 = vadd.xlane.f32.xlu1 %v128_v51  ;;  %140 = vadd.xlane.f32.xlu0 %v121_v55  ;;  %v1040_v58 = vsub.f32 %v964_v9, %v98_v56  ;;  %v282_v9 = vld [vmem:[#allocation2 + $0x30] sm:$0xff]  ;;  %v444_v51 = vld [vmem:[%s1276_s1] sm:$0xff]  ;;  %v455_v54 = vld [vmem:[%s1276_s1 + $0x58] sm:$0xff] }
  0xb4   :  { %v64_v62 = vpop.xlane.xlu0 %63  ;;  %v80_v63 = vpop.xlane.xlu1 %79  ;;  %v777_v19 = vpack.c.bf16 %v283_v16, %v282_v9  ;;  %v448_v55 = vld [vmem:[%s1276_s1 + $0x20] sm:$0xff]  ;;  %v457_v56 = vld [vmem:[%s1276_s1 + $0x68] sm:$0xff] }
  0xb5   :  { %v91_v1 = vmul.f32 0.0078125, %v64_v62  ;;  %v122_v2 = vmul.f32 %v1037_v57, %v1037_v57  ;;  %v99_v3 = vmul.f32 0.0078125, %v80_v63  ;;  %v130_v6 = vmul.f32 %v1040_v58, %v1040_v58  ;;  %v451_v62 = vld [vmem:[%s1276_s1 + $0x38] sm:$0xff]  ;;  %v452_v63 = vld [vmem:[%s1276_s1 + $0x40] sm:$0xff] }
  0xb6   :  { %778 = vmatprep.subr.bf16.mxu0 %v777_v19  ;;  %800 = vmatprep.subr.bf16.mxu1 %v777_v19 }
  0xb7   :  { %v1047_v4 = vsub.f32 %v971_v10, %v91_v1  ;;  %156 = vadd.xlane.f32.xlu1 %v129_v59  ;;  %142 = vadd.xlane.f32.xlu0 %v122_v2  ;;  %v1050_v5 = vsub.f32 %v976_v11, %v99_v3  ;;  %v449_v59 = vld [vmem:[%s1276_s1 + $0x28] sm:$0xff]  ;;  %v456_v1 = vld [vmem:[%s1276_s1 + $0x60] sm:$0xff]  ;;  %v458_v2 = vld [vmem:[%s1276_s1 + $0x70] sm:$0xff] }
  0xb8   :  { %v66_v7 = vpop.xlane.xlu0 %65  ;;  %v82_v8 = vpop.xlane.xlu1 %81  ;;  %780 = vmatpush3.bf16.msra.mxu0 %v777_v19  ;;  %808 = vmatpush3.bf16.msra.mxu1 %v777_v19 }
  0xb9   :  { %v92_v17 = vmul.f32 0.0078125, %v66_v7  ;;  %v123_v18 = vmul.f32 %v1047_v4, %v1047_v4  ;;  %v100_v10 = vmul.f32 0.0078125, %v82_v8  ;;  %v131_v21 = vmul.f32 %v1050_v5, %v1050_v5  ;;  %782 = vmatprep.subr.bf16.mxu0 %v781_v30  ;;  %801 = vmatprep.subr.bf16.mxu1 %v781_v30 }
  0xbb   :  { %v1057_v20 = vsub.f32 %v983_v12, %v92_v17  ;;  %158 = vadd.xlane.f32.xlu1 %v130_v6  ;;  %144 = vadd.xlane.f32.xlu0 %v123_v18  ;;  %v1060_v11 = vsub.f32 %v988_v13, %v100_v10 }
  0xbc   :  { %v68_v22 = vpop.xlane.xlu0 %67  ;;  %v84_v23 = vpop.xlane.xlu1 %83  ;;  %784 = vmatpush3.bf16.msra.mxu0 %v781_v30  ;;  %809 = vmatpush3.bf16.msra.mxu1 %v781_v30 }
  0xbd   :  { %v93_v28 = vmul.f32 0.0078125, %v68_v22  ;;  %v124_v29 = vmul.f32 %v1057_v20, %v1057_v20  ;;  %v101_v12 = vmul.f32 0.0078125, %v84_v23  ;;  %v132_v32 = vmul.f32 %v1060_v11, %v1060_v11  ;;  %786 = vmatprep.subr.bf16.mxu0 %v785_v38  ;;  %802 = vmatprep.subr.bf16.mxu1 %v785_v38 }
  0xbf   :  { %v1067_v13 = vsub.f32 %v995_v14, %v93_v28  ;;  %160 = vadd.xlane.f32.xlu1 %v131_v21  ;;  %146 = vadd.xlane.f32.xlu0 %v124_v29  ;;  %v1070_v31 = vsub.f32 %v1000_v15, %v101_v12  ;;  %v288_v15 = vld [vmem:[#allocation2 + $0x60] sm:$0xff] }
  0xc0   :  { %788 = vmatpush3.bf16.msra.mxu0 %v785_v38  ;;  %v789_v40 = vpack.c.bf16 %v289_v39, %v288_v15  ;;  %810 = vmatpush3.bf16.msra.mxu1 %v785_v38 }
  0xc1   :  { %v125_v37 = vmul.f32 %v1067_v13, %v1067_v13  ;;  %v133_v14 = vmul.f32 %v1070_v31, %v1070_v31 }
  0xc2   :  { %790 = vmatprep.subr.bf16.mxu0 %v789_v40  ;;  %803 = vmatprep.subr.bf16.mxu1 %v789_v40 }
  0xc3   :  { %162 = vadd.xlane.f32.xlu1 %v132_v32  ;;  %148 = vadd.xlane.f32.xlu0 %v125_v37  ;;  %v1129_v37 = vld [vmem:[%s1277_s2] ss:$0 sm:$0xff] }
  0xc4   :  { %792 = vmatpush3.bf16.msra.mxu0 %v789_v40  ;;  %811 = vmatpush3.bf16.msra.mxu1 %v789_v40 }
  0xc5   :  { %794 = vmatprep.subr.bf16.mxu0 %v793_v45  ;;  %804 = vmatprep.subr.bf16.mxu1 %v793_v45 }
  0xc7   :  { %164 = vadd.xlane.f32.xlu1 %v133_v14 }
  0xc8   :  { %796 = vmatpush3.bf16.msra.mxu0 %v793_v45  ;;  %812 = vmatpush3.bf16.msra.mxu1 %v793_v45 }
  0xd8   :  { %467 = vperm.xlu1 %818, %v445_v46  }
  0xd9   :  { %462 = vperm.xlu0 %817, %v444_v51  }
  0xdc   :  { %472 = vperm.xlu1 %818, %v446_v48  }
  0xdd   :  { %507 = vperm.xlu0 %817, %v453_v52  }
  0xe0   :  { %477 = vperm.xlu1 %818, %v447_v53  }
  0xe1   :  { %517 = vperm.xlu0 %817, %v455_v54  }
  0xe4   :  { %482 = vperm.xlu1 %818, %v448_v55  }
  0xe5   :  { %527 = vperm.xlu0 %817, %v457_v56  }
  0xe8   :  { %487 = vperm.xlu1 %818, %v449_v59  }
  0xe9   :  { %537 = vperm.xlu0 %817, %v459_v60  }
  0xec   :  { %492 = vperm.xlu1 %818, %v450_v61  }
  0xf0   :  { %497 = vperm.xlu1 %818, %v451_v62  }
  0xf4   :  { %502 = vperm.xlu1 %818, %v452_v63  }
  0xf8   :  { %512 = vperm.xlu1 %818, %v454_v0  }
  0xfc   :  { %522 = vperm.xlu1 %818, %v456_v1  }
 0x100   :  { %532 = vperm.xlu1 %818, %v458_v2  }
 0x134   :  { %v135_v3 = vpop.xlane.xlu0 %134 }
 0x135   :  { %v166_v6 = vmul.f32 0.0078125, %v135_v3 }
 0x137   :  { %v182_v7 = vadd.f32 1e-05, %v166_v6 }
 0x138   :  { %v151_v8 = vpop.xlane.xlu1 %150  ;;  %v137_v9 = vpop.xlane.xlu0 %136 }
 0x139   :  { %819 = vrsqrt.f32 %v182_v7  ;;  %v174_v16 = vmul.f32 0.0078125, %v151_v8  ;;  %v167_v17 = vmul.f32 0.0078125, %v137_v9 }
 0x13b   :  { %v190_v18 = vadd.f32 1e-05, %v174_v16  ;;  %v183_v10 = vadd.f32 1e-05, %v167_v17 }
 0x13c   :  { %v153_v19 = vpop.xlane.xlu1 %152  ;;  %v139_v21 = vpop.xlane.xlu0 %138 }
 0x13d   :  { %821 = vrsqrt.f32 %v190_v18  ;;  %v175_v22 = vmul.f32 0.0078125, %v153_v19  ;;  %v168_v23 = vmul.f32 0.0078125, %v139_v21 }
 0x13e   :  { %823 = vrsqrt.f32 %v183_v10 }
 0x13f   :  { %v191_v24 = vadd.f32 1e-05, %v175_v22  ;;  %v184_v25 = vadd.f32 1e-05, %v168_v23 }
 0x140   :  { %v155_v28 = vpop.xlane.xlu1 %154  ;;  %v141_v29 = vpop.xlane.xlu0 %140 }
 0x141   :  { %825 = vrsqrt.f32 %v191_v24  ;;  %v176_v12 = vmul.f32 0.0078125, %v155_v28  ;;  %v169_v30 = vmul.f32 0.0078125, %v141_v29 }
 0x142   :  { %827 = vrsqrt.f32 %v184_v25 }
 0x143   :  { %v820_v32 = vpop.eup %819  ;;  %v192_v35 = vadd.f32 1e-05, %v176_v12  ;;  %v185_v36 = vadd.f32 1e-05, %v169_v30 }
 0x144   :  { %v157_v38 = vpop.xlane.xlu1 %156  ;;  %v143_v14 = vpop.xlane.xlu0 %142  ;;  %v214_v15 = vmul.f32 %v820_v32, %v1004_v26 }
 0x145   :  { %829 = vrsqrt.f32 %v192_v35  ;;  %v177_v39 = vmul.f32 0.0078125, %v157_v38  ;;  %v170_v40 = vmul.f32 0.0078125, %v143_v14 }
 0x146   :  { %831 = vrsqrt.f32 %v185_v36  ;;  %v237_v44 = vmul.f32 %v1129_v37, %v214_v15 }
 0x147   :  { %v822_v45 = vpop.eup %821  ;;  %v193_v46 = vadd.f32 1e-05, %v177_v39  ;;  %v186_v47 = vadd.f32 1e-05, %v170_v40 }
 0x148   :  { %v824_v48 = vpop.eup %823  ;;  %v159_v51 = vpop.xlane.xlu1 %158  ;;  %v260_v53 = vadd.f32 %v1135_v43, %v237_v44  ;;  %v222_v26 = vmul.f32 %v822_v45, %v1010_v33 }
 0x149   :  { %v145_v52 = vpop.xlane.xlu0 %144  ;;  %833 = vrsqrt.f32 %v193_v46  ;;  %v178_v54 = vmul.f32 0.0078125, %v159_v51  ;;  %v215_v56 = vmul.f32 %v824_v48, %v1006_v27 }
 0x14a   :  { %v171_v55 = vmul.f32 0.0078125, %v145_v52  ;;  %835 = vrsqrt.f32 %v186_v47  ;;  %741 = vmatprep.mubr.f32.mxu0 %v260_v53  ;;  %v245_v59 = vmul.f32 %v1129_v37, %v222_v26 }
 0x14b   :  { %v826_v60 = vpop.eup %825  ;;  %v194_v61 = vadd.f32 1e-05, %v178_v54  ;;  %v238_v63 = vmul.f32 %v1129_v37, %v215_v56 }
 0x14c   :  { %v187_v62 = vadd.f32 1e-05, %v171_v55  ;;  %v828_v0 = vpop.eup %827  ;;  %v161_v1 = vpop.xlane.xlu1 %160  ;;  %v268_v3 = vadd.f32 %v1135_v43, %v245_v59  ;;  %v223_v33 = vmul.f32 %v826_v60, %v1012_v34 }
 0x14d   :  { %v147_v2 = vpop.xlane.xlu0 %146  ;;  %837 = vrsqrt.f32 %v194_v61  ;;  %v179_v6 = vmul.f32 0.0078125, %v161_v1  ;;  %v261_v27 = vadd.f32 %v1135_v43, %v238_v63  ;;  %v216_v8 = vmul.f32 %v828_v0, %v1018_v41 }
 0x14e   :  { %v172_v7 = vmul.f32 0.0078125, %v147_v2  ;;  %839 = vrsqrt.f32 %v187_v62  ;;  %753 = vmatprep.mubr.f32.mxu1 %v268_v3  ;;  %v246_v9 = vmul.f32 %v1129_v37, %v223_v33 }
 0x14f   :  { %v830_v16 = vpop.eup %829  ;;  %v195_v17 = vadd.f32 1e-05, %v179_v6  ;;  %742 = vmatmul.mubr.f32.vlgmr.msra.gmra.mrb[0].mxu0 %v261_v27  ;;  %v239_v34 = vmul.f32 %v1129_v37, %v216_v8 }
 0x150   :  { %v188_v18 = vadd.f32 1e-05, %v172_v7  ;;  %v832_v10 = vpop.eup %831  ;;  %v163_v19 = vpop.xlane.xlu1 %162  ;;  %v269_v22 = vadd.f32 %v1135_v43, %v246_v9  ;;  %v224_v23 = vmul.f32 %v830_v16, %v1020_v42 }
 0x151   :  { %v149_v21 = vpop.xlane.xlu0 %148  ;;  %841 = vrsqrt.f32 %v195_v17  ;;  %v180_v24 = vmul.f32 0.0078125, %v163_v19  ;;  %v217_v41 = vmul.f32 %v832_v10, %v1027_v49  ;;  %v262_v28 = vadd.f32 %v1135_v43, %v239_v34 }
 0x152   :  { %v173_v25 = vmul.f32 0.0078125, %v149_v21  ;;  %843 = vrsqrt.f32 %v188_v18  ;;  %754 = vmatmul.mubr.f32.vlgmr.msra.gmra.mrb[0].mxu1 %v269_v22  ;;  %v247_v29 = vmul.f32 %v1129_v37, %v224_v23 }
 0x153   :  { %v834_v12 = vpop.eup %833  ;;  %v196_v30 = vadd.f32 1e-05, %v180_v24  ;;  %v240_v35 = vmul.f32 %v1129_v37, %v217_v41  ;;  %744 = vmatprep.mubr.f32.mxu0 %v262_v28 }
 0x154   :  { %v189_v32 = vadd.f32 1e-05, %v173_v25  ;;  %v836_v36 = vpop.eup %835  ;;  %v165_v38 = vpop.xlane.xlu1 %164  ;;  %v270_v42 = vadd.f32 %v1135_v43, %v247_v29  ;;  %v225_v14 = vmul.f32 %v834_v12, %v1030_v50 }
 0x155   :  { %845 = vrsqrt.f32 %v196_v30  ;;  %v181_v49 = vmul.f32 0.0078125, %v165_v38  ;;  %v263_v15 = vadd.f32 %v1135_v43, %v240_v35  ;;  %v218_v39 = vmul.f32 %v836_v36, %v1037_v57 }
 0x156   :  { %847 = vrsqrt.f32 %v189_v32  ;;  %756 = vmatprep.mubr.f32.mxu1 %v270_v42  ;;  %v248_v40 = vmul.f32 %v1129_v37, %v225_v14 }
 0x157   :  { %v838_v44 = vpop.eup %837  ;;  %v197_v45 = vadd.f32 1e-05, %v181_v49  ;;  %745 = vmatmul.mubr.f32.gmra.mrb[2].mxu0 %v263_v15  ;;  %v241_v46 = vmul.f32 %v1129_v37, %v218_v39 }
 0x158   :  { %v840_v47 = vpop.eup %839  ;;  %v271_v48 = vadd.f32 %v1135_v43, %v248_v40  ;;  %v226_v50 = vmul.f32 %v838_v44, %v1040_v58  ;;  %v463_v10 = vpop.permute.xlu0 %462 }
 0x159   :  { %849 = vrsqrt.f32 %v197_v45  ;;  %v264_v51 = vadd.f32 %v1135_v43, %v241_v46  ;;  %v219_v52 = vmul.f32 %v840_v47, %v1047_v4 }
 0x15a   :  { %757 = vmatmul.mubr.f32.gmra.mrb[2].mxu1 %v271_v48  ;;  %v249_v57 = vmul.f32 %v1129_v37, %v226_v50 }
 0x15b   :  { %v842_v53 = vpop.eup %841  ;;  %747 = vmatprep.mubr.f32.mxu0 %v264_v51  ;;  %v242_v26 = vmul.f32 %v1129_v37, %v219_v52 }
 0x15c   :  { %v844_v54 = vpop.eup %843  ;;  %v272_v55 = vadd.f32 %v1135_v43, %v249_v57  ;;  %v227_v56 = vmul.f32 %v842_v53, %v1050_v5  ;;  %v508_v29 = vpop.permute.xlu0 %507 }
 0x15d   :  { %v265_v59 = vadd.f32 %v1135_v43, %v242_v26  ;;  %v220_v58 = vmul.f32 %v844_v54, %v1057_v20 }
 0x15e   :  { %759 = vmatprep.mubr.f32.mxu1 %v272_v55  ;;  %v250_v60 = vmul.f32 %v1129_v37, %v227_v56 }
 0x15f   :  { %v846_v4 = vpop.eup %845  ;;  %748 = vmatmul.mubr.f32.gmra.mrb[4].mxu0 %v265_v59  ;;  %v243_v61 = vmul.f32 %v1129_v37, %v220_v58 }
 0x160   :  { %v848_v62 = vpop.eup %847  ;;  %v273_v63 = vadd.f32 %v1135_v43, %v250_v60  ;;  %v228_v0 = vmul.f32 %v846_v4, %v1060_v11  ;;  %v518_v48 = vpop.permute.xlu0 %517 }
 0x161   :  { %v266_v1 = vadd.f32 %v1135_v43, %v243_v61  ;;  %v221_v5 = vmul.f32 %v848_v62, %v1067_v13  ;;  %v468_v13 = vpop.permute.xlu1 %467 }
 0x162   :  { %760 = vmatmul.mubr.f32.gmra.mrb[4].mxu1 %v273_v63  ;;  %v251_v2 = vmul.f32 %v1129_v37, %v228_v0 }
 0x163   :  { %v850_v20 = vpop.eup %849  ;;  %750 = vmatprep.mubr.f32.mxu0 %v266_v1  ;;  %v244_v3 = vmul.f32 %v1129_v37, %v221_v5 }
 0x164   :  { %v274_v33 = vadd.f32 %v1135_v43, %v251_v2  ;;  %v229_v6 = vmul.f32 %v850_v20, %v1070_v31  ;;  %v1189_v31 = vld [vmem:[%s1280_s5] ss:$0 sm:$0xff]  ;;  %v528_v1 = vpop.permute.xlu0 %527 }
 0x165   :  { %v267_v7 = vadd.f32 %v1135_v43, %v244_v3  ;;  %v473_v8 = vpop.permute.xlu1 %472 }
 0x166   :  { %762 = vmatprep.mubr.f32.mxu1 %v274_v33  ;;  %v252_v11 = vmul.f32 %v1129_v37, %v229_v6 }
 0x167   :  { %751 = vmatmul.mubr.f32.gmra.mrb[6].mxu0 %v267_v7 }
 0x168   :  { %v275_v27 = vadd.f32 %v1135_v43, %v252_v11 }
 0x169   :  { %v478_v9 = vpop.permute.xlu1 %477 }
 0x16a   :  { %763 = vmatmul.mubr.f32.gmra.mrb[6].mxu1 %v275_v27 }
 0x16d   :  { %v483_v16 = vpop.permute.xlu1 %482 }
 0x171   :  { %v488_v17 = vpop.permute.xlu1 %487 }
 0x175   :  { %v1184_v18 = vpop.permute.xlu1 %492 }
 0x179   :  { %v1191_v19 = vpop.permute.xlu1 %497 }
 0x17d   :  { %v503_v30 = vpop.permute.xlu1 %502 }
 0x181   :  { %v513_v52 = vpop.permute.xlu1 %512 }
 0x185   :  { %v523_v20 = vpop.permute.xlu1 %522 }
 0x222   :  { %v743_v37 = vpop.f32.mrb[0].mxu0 }
 0x223   :  { %v371_v21 = vadd.f32 %v743_v37, %v1189_v31  ;;  %v365_v43 = vpop.f32.mrb[1].mxu0 }
 0x224   :  { %v366_v34 = vadd.f32 %v1189_v31, %v365_v43  ;;  %v538_v43 = vpop.permute.xlu0 %537 }
 0x225   :  { %v541_v22 = vmul.f32 %v468_v13, %v371_v21  ;;  %v755_v23 = vpop.f32.mrb[0].mxu1 }
 0x226   :  { %v540_v24 = vmul.f32 %v463_v10, %v366_v34  ;;  %v411_v25 = vadd.f32 %v755_v23, %v1189_v31  ;;  %v405_v41 = vpop.f32.mrb[1].mxu1  ;;  %v533_v23 = vpop.permute.xlu1 %532 }
 0x227   :  { %v662_v28 = vpack.c.bf16 %v541_v22, %v541_v22  ;;  %v406_v12 = vadd.f32 %v1189_v31, %v405_v41 }
 0x228   :  { %v661_v32 = vpack.c.bf16 %v540_v24, %v540_v24  ;;  %v549_v35 = vmul.f32 %v508_v29, %v411_v25 }
 0x229   :  { %622 = vst.msk [vmem:[%s1281_s6 + $0x4] sm:$0xf] %vm620_vm0, %v662_v28  ;;  %v548_v36 = vmul.f32 %v503_v30, %v406_v12 }
 0x22a   :  { %621 = vst.msk [vmem:[%s1281_s6] sm:$0xf] %vm620_vm0, %v661_v32  ;;  %v670_v38 = vpack.c.bf16 %v549_v35, %v549_v35  ;;  %v746_v42 = vpop.f32.mrb[2].mxu0 }
 0x22b   :  { %v669_v14 = vpack.c.bf16 %v548_v36, %v548_v36  ;;  %v381_v49 = vadd.f32 %v746_v42, %v1189_v31  ;;  %v375_v15 = vpop.f32.mrb[3].mxu0 }
 0x22c   :  { %630 = vst.msk [vmem:[%s1281_s6 + $0x24] sm:$0xf] %vm620_vm0, %v670_v38  ;;  %v376_v39 = vadd.f32 %v1189_v31, %v375_v15 }
 0x22d   :  { %629 = vst.msk [vmem:[%s1281_s6 + $0x20] sm:$0xf] %vm620_vm0, %v669_v14  ;;  %v543_v40 = vmul.f32 %v478_v9, %v381_v49  ;;  %v758_v44 = vpop.f32.mrb[2].mxu1 }
 0x22e   :  { %v542_v45 = vmul.f32 %v473_v8, %v376_v39  ;;  %v421_v46 = vadd.f32 %v758_v44, %v1189_v31  ;;  %v415_v47 = vpop.f32.mrb[3].mxu1 }
 0x22f   :  { %v664_v50 = vpack.c.bf16 %v543_v40, %v543_v40  ;;  %v416_v51 = vadd.f32 %v1189_v31, %v415_v47 }
 0x230   :  { %v663_v57 = vpack.c.bf16 %v542_v45, %v542_v45  ;;  %v551_v53 = vmul.f32 %v518_v48, %v421_v46 }
 0x231   :  { %624 = vst.msk [vmem:[%s1281_s6 + $0xc] sm:$0xf] %vm620_vm0, %v664_v50  ;;  %v550_v26 = vmul.f32 %v513_v52, %v416_v51 }
 0x232   :  { %623 = vst.msk [vmem:[%s1281_s6 + $0x8] sm:$0xf] %vm620_vm0, %v663_v57  ;;  %v672_v54 = vpack.c.bf16 %v551_v53, %v551_v53  ;;  %v749_v55 = vpop.f32.mrb[4].mxu0 }
 0x233   :  { %v671_v56 = vpack.c.bf16 %v550_v26, %v550_v26  ;;  %v391_v59 = vadd.f32 %v749_v55, %v1189_v31  ;;  %v385_v58 = vpop.f32.mrb[5].mxu0 }
 0x234   :  { %632 = vst.msk [vmem:[%s1281_s6 + $0x2c] sm:$0xf] %vm620_vm0, %v672_v54  ;;  %v386_v60 = vadd.f32 %v1189_v31, %v385_v58 }
 0x235   :  { %631 = vst.msk [vmem:[%s1281_s6 + $0x28] sm:$0xf] %vm620_vm0, %v671_v56  ;;  %v545_v4 = vmul.f32 %v488_v17, %v391_v59  ;;  %v761_v61 = vpop.f32.mrb[4].mxu1 }
 0x236   :  { %v544_v62 = vmul.f32 %v483_v16, %v386_v60  ;;  %v431_v63 = vadd.f32 %v761_v61, %v1189_v31  ;;  %v425_v0 = vpop.f32.mrb[5].mxu1 }
 0x237   :  { %v666_v5 = vpack.c.bf16 %v545_v4, %v545_v4  ;;  %v426_v2 = vadd.f32 %v1189_v31, %v425_v0 }
 0x238   :  { %v665_v3 = vpack.c.bf16 %v544_v62, %v544_v62  ;;  %v553_v33 = vmul.f32 %v528_v1, %v431_v63 }
 0x239   :  { %626 = vst.msk [vmem:[%s1281_s6 + $0x14] sm:$0xf] %vm620_vm0, %v666_v5  ;;  %v552_v6 = vmul.f32 %v523_v20, %v426_v2 }
 0x23a   :  { %625 = vst.msk [vmem:[%s1281_s6 + $0x10] sm:$0xf] %vm620_vm0, %v665_v3  ;;  %v674_v7 = vpack.c.bf16 %v553_v33, %v553_v33  ;;  %v752_v11 = vpop.f32.mrb[6].mxu0 }
 0x23b   :  { %v673_v27 = vpack.c.bf16 %v552_v6, %v552_v6  ;;  %v401_v13 = vadd.f32 %v752_v11, %v1189_v31  ;;  %v395_v8 = vpop.f32.mrb[7].mxu0 }
 0x23c   :  { %634 = vst.msk [vmem:[%s1281_s6 + $0x34] sm:$0xf] %vm620_vm0, %v674_v7  ;;  %v396_v9 = vadd.f32 %v1189_v31, %v395_v8 }
 0x23d   :  { %633 = vst.msk [vmem:[%s1281_s6 + $0x30] sm:$0xf] %vm620_vm0, %v673_v27  ;;  %v547_v16 = vmul.f32 %v1191_v19, %v401_v13  ;;  %v764_v17 = vpop.f32.mrb[6].mxu1 }
 0x23e   :  { %v546_v10 = vmul.f32 %v1184_v18, %v396_v9  ;;  %v441_v37 = vadd.f32 %v764_v17, %v1189_v31  ;;  %v435_v21 = vpop.f32.mrb[7].mxu1 }
 0x23f   :  { %v668_v34 = vpack.c.bf16 %v547_v16, %v547_v16  ;;  %v436_v22 = vadd.f32 %v1189_v31, %v435_v21 }
 0x240   :  { %v667_v24 = vpack.c.bf16 %v546_v10, %v546_v10  ;;  %v555_v25 = vmul.f32 %v538_v43, %v441_v37 }
 0x241   :  { %628 = vst.msk [vmem:[%s1281_s6 + $0x1c] sm:$0xf] %vm620_vm0, %v668_v34  ;;  %v554_v41 = vmul.f32 %v533_v23, %v436_v22 }
 0x242   :  { %627 = vst.msk [vmem:[%s1281_s6 + $0x18] sm:$0xf] %vm620_vm0, %v667_v24  ;;  %v676_v18 = vpack.c.bf16 %v555_v25, %v555_v25 }
 0x243   :  { %v675_v19 = vpack.c.bf16 %v554_v41, %v554_v41 }
 0x244   :  { %636 = vst.msk [vmem:[%s1281_s6 + $0x3c] sm:$0xf] %vm620_vm0, %v676_v18 }
 0x245   :  { %635 = vst.msk [vmem:[%s1281_s6 + $0x38] sm:$0xf] %vm620_vm0, %v675_v19 }
 0x246   :  { %641 = vsyncpa [#allocation3], 1 }

// kernel: _lambda_.3
= control target key start
LH: loop header
LB: loop body
LE: loop exit
PB: predicated region body
PF: predicated region fallthrough
CT: control target
= control target key end

     0   :  { %10 = vsyncpa [#allocation4], 0  ;;  %s2843_s18 = smov 0   ;;  %s2845_s19 = smov 0   ;;  %s3301_s0 = inlined_call_operand.vmem [shape: bf16[8,512], index: 0, kind: input, shape index: {}]   ;;  %s3302_s1 = inlined_call_operand.vmem [shape: bf16[32,8,16], index: 1, kind: input, shape index: {}]   ;;  %s3303_s2 = inlined_call_operand.vmem [shape: bf16[32,32,64], index: 2, kind: input, shape index: {}]   ;;  %s3304_s3 = inlined_call_operand.vmem [shape: f32[1,1,64], index: 3, kind: input, shape index: {}]   ;;  %s3305_s4 = inlined_call_operand.vmem [shape: f32[16,16,1], index: 4, kind: input, shape index: {}]   ;;  %s3306_s5 = inlined_call_operand.hbm [shape: f32[16,16,64], index: 5, kind: output, shape index: {}]  }
   0x1   :  { %s2847_s20 = smov 0  }
   0x2 LB: > { %s2359_s21 = sadd.s32 4294967295, %s2804_s20   ;;  %s25_s22 = sadd.s32 1, %s2800_s19  ;;  %s2804_s20 = sphi %s2847_s20, %s16_s20   ;;  %s2800_s19 = sphi %s2845_s19, %s3309_s19   ;;  %s2796_s18 = sphi %s2843_s18, %s3308_s18  }
   0x3   : > { %p26_p0 = scmp.ge.s32.totalorder %s25_s22, 32  ;;  %p2364_p1 = scmp.ge.s32.totalorder %s2804_s20, 1 }
   0x4   : > { %p232_p2 = scmp.lt.s32.totalorder %s2804_s20, 33 }
   0x5   : > { %s3311_s22 = smov (%p26_p0, %s25_s22), 0 }
   0x6   : > { %p233_p3 = pnand %p2364_p1, %p232_p2 }
   0x7   : > { %p276_p4 = scmp.lt.s32.totalorder (!%p233_p3), %s2796_s18, 31  ;;  %p2368_p5 = scmp.ne.s32.totalorder (!%p233_p3), %s2796_s18, 0 }
   0x8   : > { %236 = sbr.rel (%p233_p3) target bundleno = 960 (0x3c0), region = 40 }
   0xf   : > { %s277_s23 = scalar_select %p276_p4, %s2796_s18, 31 }
  0x10   : > { %297 = sbr.rel (%p2368_p5) target bundleno = 33 (0x21), region = 44  ;;  %vm298_vm0 = vcmask (!%p2368_p5), 523264   ;;  %v2806_v0 = vmov (!%p2368_p5), 0.0  }
  0x11   : > { %s2365_s24 = sshll.u32 %s277_s23, 2  ;;  %s2429_s25 = sshll.u32 %s277_s23, 4  ;;  %299 = vst.msk [vmem:[#allocation2] sm:$0xff] (!%p2368_p5), %vm298_vm0, %v2806_v0  ;;  %300 = vst.msk [vmem:[#allocation2 + $0x8] sm:$0xff] (!%p2368_p5), %vm298_vm0, %v2806_v0 }
  0x12   : > { %s2869_s28 = scalar_lea.vmem %s3302_s1, %s2365_s24  ;;  %s2874_s6 = scalar_lea.vmem %s3303_s2, %s2429_s25  ;;  %301 = vst.msk [vmem:[#allocation2 + $0x10] sm:$0xff] (!%p2368_p5), %vm298_vm0, %v2806_v0  ;;  %302 = vst.msk [vmem:[#allocation2 + $0x18] sm:$0xff] (!%p2368_p5), %vm298_vm0, %v2806_v0 }
  0x13   : > { %303 = vst.msk [vmem:[#allocation2 + $0x20] sm:$0xff] (!%p2368_p5), %vm298_vm0, %v2806_v0  ;;  %304 = vst.msk [vmem:[#allocation2 + $0x28] sm:$0xff] (!%p2368_p5), %vm298_vm0, %v2806_v0 }
  0x14   : > { %305 = vst.msk [vmem:[#allocation2 + $0x30] sm:$0xff] (!%p2368_p5), %vm298_vm0, %v2806_v0  ;;  %306 = vst.msk [vmem:[#allocation2 + $0x38] sm:$0xff] (!%p2368_p5), %vm298_vm0, %v2806_v0 }
  0x15   : > { %307 = vst.msk [vmem:[#allocation2 + $0x40] sm:$0xff] (!%p2368_p5), %vm298_vm0, %v2806_v0  ;;  %308 = vst.msk [vmem:[#allocation2 + $0x48] sm:$0xff] (!%p2368_p5), %vm298_vm0, %v2806_v0 }
  0x16   : > { %309 = vst.msk [vmem:[#allocation2 + $0x50] sm:$0xff] (!%p2368_p5), %vm298_vm0, %v2806_v0  ;;  %310 = vst.msk [vmem:[#allocation2 + $0x58] sm:$0xff] (!%p2368_p5), %vm298_vm0, %v2806_v0 }
  0x17   : > { %311 = vst.msk [vmem:[#allocation2 + $0x60] sm:$0xff] %vm298_vm0, %v2806_v0  ;;  %312 = vst.msk [vmem:[#allocation2 + $0x68] sm:$0xff] %vm298_vm0, %v2806_v0 }
  0x18   : > { %313 = vst.msk [vmem:[#allocation2 + $0x70] sm:$0xff] %vm298_vm0, %v2806_v0  ;;  %314 = vst.msk [vmem:[#allocation2 + $0x78] sm:$0xff] %vm298_vm0, %v2806_v0 }
  0x19   : > { %315 = vst.msk [vmem:[#allocation2 + $0x80] sm:$0xff] %vm298_vm0, %v2806_v0  ;;  %316 = vst.msk [vmem:[#allocation2 + $0x88] sm:$0xff] %vm298_vm0, %v2806_v0 }
  0x1a   : > { %317 = vst.msk [vmem:[#allocation2 + $0x90] sm:$0xff] %vm298_vm0, %v2806_v0  ;;  %318 = vst.msk [vmem:[#allocation2 + $0x98] sm:$0xff] %vm298_vm0, %v2806_v0 }
  0x1b   : > { %319 = vst.msk [vmem:[#allocation2 + $0xa0] sm:$0xff] %vm298_vm0, %v2806_v0  ;;  %320 = vst.msk [vmem:[#allocation2 + $0xa8] sm:$0xff] %vm298_vm0, %v2806_v0 }
  0x1c   : > { %321 = vst.msk [vmem:[#allocation2 + $0xb0] sm:$0xff] %vm298_vm0, %v2806_v0  ;;  %322 = vst.msk [vmem:[#allocation2 + $0xb8] sm:$0xff] %vm298_vm0, %v2806_v0 }
  0x1d   : > { %323 = vst.msk [vmem:[#allocation2 + $0xc0] sm:$0xff] %vm298_vm0, %v2806_v0  ;;  %324 = vst.msk [vmem:[#allocation2 + $0xc8] sm:$0xff] %vm298_vm0, %v2806_v0 }
  0x1e   : > { %325 = vst.msk [vmem:[#allocation2 + $0xd0] sm:$0xff] %vm298_vm0, %v2806_v0  ;;  %326 = vst.msk [vmem:[#allocation2 + $0xd8] sm:$0xff] %vm298_vm0, %v2806_v0 }
  0x1f   : > { %327 = vst.msk [vmem:[#allocation2 + $0xe0] sm:$0xff] %vm298_vm0, %v2806_v0  ;;  %328 = vst.msk [vmem:[#allocation2 + $0xe8] sm:$0xff] %vm298_vm0, %v2806_v0 }
  0x20   : > { %329 = vst.msk [vmem:[#allocation2 + $0xf0] sm:$0xff] %vm298_vm0, %v2806_v0  ;;  %330 = vst.msk [vmem:[#allocation2 + $0xf8] sm:$0xff] %vm298_vm0, %v2806_v0 }
  0x21 PF: > { %v331_v1 = vld [vmem:[%s3301_s0] sm:$0xff]  ;;  %v332_v2 = vld [vmem:[%s3301_s0 + $0x8] sm:$0xff]  ;;  %vm509_vm1 = vcmask 1043456   ;;  %vm412_vm2 = vcmask 64512   ;;  %v2807_v42 = vmov 0.0   ;;  %vm2808_vm3 = vmmov 0  }
  0x22   : > { %v333_v3 = vld [vmem:[%s2869_s28] sm:$0xf]  ;;  %v2369_v4 = vcombine.low %v331_v1, %v331_v1  ;;  %v2371_v5 = vcombine.low %v332_v2, %v332_v2  ;;  %v2370_v7 = vcombine.high %v331_v1, %v331_v1  ;;  %v2372_v8 = vcombine.high %v332_v2, %v332_v2  ;;  %2577 = vmatprep.subr.bf16.mxu1 %v2807_v42  ;;  %v2955_v43 = vld [vmem:[%s2874_s6 + $0x8] sm:$0xff]   ;;  %p2423_p6 = scmp.ne.s32.totalorder %s2796_s18, 31 }
  0x23   : > { %2705 = vmatprep.subr.msk.bf16.mxu0 %vm509_vm1, %v333_v3  ;;  %v511_v6 = vsel %vm509_vm1, %v333_v3, 0  ;;  %v2949_v41 = vld [vmem:[%s2874_s6] sm:$0xff]   ;;  %2581 = vmatprep.mubr.msk.bf16.mxu1 %vm2808_vm3, %v2807_v42  ;;  %vm868_vm4 = vcmask 261120   ;;  %vm915_vm5 = vcmask 523264  }
  0x24   : > { %348 = vxpose.xlu0.c.b16.start.end [1/1] (short) %v2369_v4, 128  ;;  %380 = vxpose.xlu1.c.b16.start.end [1/1] (short) %v2371_v5, 128 }
  0x25   : > { %2512 = vmatpush3.bf16.msra.mxu0 %v511_v6  ;;  %2578 = vmatpush3.bf16.msra.mxu1 %v2949_v41 }
  0x26   : > { %2579 = vmatprep.subr.bf16.mxu1 %v2807_v42 }
  0x29   : > { %2580 = vmatpush3.bf16.msra.mxu1 %v2955_v43 }
  0x2a   : > { %2585 = vmatprep.subr.bf16.mxu1 %v2807_v42 }
  0x41   : > { %364 = vxpose.xlu0.c.b16.start.end [1/1] (short) %v2370_v7, 128  ;;  %396 = vxpose.xlu1.c.b16.start.end [1/1] (short) %v2372_v8, 128 }
  0x8a   : > { %v356_v9 = vpop.trf.xlu0  ;;  %v388_v17 = vpop.trf.xlu1 }
  0x8b   : > { %2513 = vmatprep.mubr.msk.bf16.mxu0 %vm412_vm2, %v356_v9 }
  0x8e   : > { %v357_v10 = vpop.trf.xlu0  ;;  %v389_v20 = vpop.trf.xlu1 }
  0x8f   : > { %2514 = vmatmul.mubr.msk.bf16.vlgmr.msra.gmra.mrb[0].mxu0 %vm412_vm2, %v357_v10 }
  0x92   : > { %v358_v11 = vpop.trf.xlu0  ;;  %v390_v22 = vpop.trf.xlu1 }
  0x93   : > { %2517 = vmatprep.mubr.msk.bf16.mxu0 %vm412_vm2, %v358_v11 }
  0x96   : > { %v359_v12 = vpop.trf.xlu0  ;;  %v391_v25 = vpop.trf.xlu1 }
  0x97   : > { %2518 = vmatmul.mubr.msk.bf16.gmra.mrb[4].mxu0 %vm412_vm2, %v359_v12 }
  0x9a   : > { %v360_v13 = vpop.trf.xlu0  ;;  %v392_v27 = vpop.trf.xlu1 }
  0x9b   : > { %2521 = vmatprep.mubr.msk.bf16.mxu0 %vm412_vm2, %v360_v13 }
  0x9e   : > { %v361_v14 = vpop.trf.xlu0  ;;  %v393_v30 = vpop.trf.xlu1 }
  0x9f   : > { %2522 = vmatmul.mubr.msk.bf16.gmra.mrb[8].mxu0 %vm412_vm2, %v361_v14 }
  0xa2   : > { %v362_v15 = vpop.trf.xlu0  ;;  %v394_v31 = vpop.trf.xlu1 }
  0xa3   : > { %2525 = vmatprep.mubr.msk.bf16.mxu0 %vm412_vm2, %v362_v15 }
  0xa6   : > { %v363_v16 = vpop.trf.xlu0  ;;  %v395_v32 = vpop.trf.xlu1 }
  0xa7   : > { %2526 = vmatmul.mubr.msk.bf16.gmra.mrb[12].mxu0 %vm412_vm2, %v363_v16 }
  0xaa   : > { %v372_v18 = vpop.trf.xlu0  ;;  %v404_v33 = vpop.trf.xlu1 }
  0xab   : > { %2529 = vmatprep.mubr.msk.bf16.mxu0 %vm412_vm2, %v372_v18 }
  0xae   : > { %v373_v19 = vpop.trf.xlu0  ;;  %v405_v34 = vpop.trf.xlu1 }
  0xaf   : > { %2530 = vmatmul.mubr.msk.bf16.gmra.mrb[16].mxu0 %vm412_vm2, %v373_v19 }
  0xb2   : > { %v374_v21 = vpop.trf.xlu0  ;;  %v406_v35 = vpop.trf.xlu1 }
  0xb3   : > { %2533 = vmatprep.mubr.msk.bf16.mxu0 %vm412_vm2, %v374_v21 }
  0xb6   : > { %v375_v23 = vpop.trf.xlu0  ;;  %v407_v36 = vpop.trf.xlu1 }
  0xb7   : > { %2534 = vmatmul.mubr.msk.bf16.gmra.mrb[20].mxu0 %vm412_vm2, %v375_v23 }
  0xba   : > { %v376_v24 = vpop.trf.xlu0  ;;  %v408_v37 = vpop.trf.xlu1 }
  0xbb   : > { %2537 = vmatprep.mubr.msk.bf16.mxu0 %vm412_vm2, %v376_v24 }
  0xbe   : > { %v377_v26 = vpop.trf.xlu0  ;;  %v409_v38 = vpop.trf.xlu1 }
  0xbf   : > { %2538 = vmatmul.mubr.msk.bf16.gmra.mrb[24].mxu0 %vm412_vm2, %v377_v26 }
  0xc2   : > { %v378_v28 = vpop.trf.xlu0  ;;  %v410_v39 = vpop.trf.xlu1 }
  0xc3   : > { %2541 = vmatprep.mubr.msk.bf16.mxu0 %vm412_vm2, %v378_v28 }
  0xc6   : > { %v379_v29 = vpop.trf.xlu0  ;;  %v411_v40 = vpop.trf.xlu1 }
  0xc7   : > { %2542 = vmatmul.mubr.msk.bf16.gmra.mrb[28].mxu0 %vm412_vm2, %v379_v29 }
  0xc8   : > { %2545 = vmatprep.mubr.msk.bf16.mxu0 %vm412_vm2, %v388_v17 }
  0xcf   : > { %2546 = vmatmul.mubr.msk.bf16.gmra.mrb[32].mxu0 %vm412_vm2, %v389_v20 }
  0xd0   : > { %2549 = vmatprep.mubr.msk.bf16.mxu0 %vm412_vm2, %v390_v22 }
  0xd7   : > { %2550 = vmatmul.mubr.msk.bf16.gmra.mrb[36].mxu0 %vm412_vm2, %v391_v25 }
  0xd8   : > { %2553 = vmatprep.mubr.msk.bf16.mxu0 %vm412_vm2, %v392_v27 }
  0xdf   : > { %2554 = vmatmul.mubr.msk.bf16.gmra.mrb[40].mxu0 %vm412_vm2, %v393_v30 }
  0xe0   : > { %2557 = vmatprep.mubr.msk.bf16.mxu0 %vm412_vm2, %v394_v31 }
  0xe7   : > { %2558 = vmatmul.mubr.msk.bf16.gmra.mrb[44].mxu0 %vm412_vm2, %v395_v32 }
  0xe8   : > { %2561 = vmatprep.mubr.msk.bf16.mxu0 %vm412_vm2, %v404_v33 }
  0xef   : > { %2562 = vmatmul.mubr.msk.bf16.gmra.mrb[48].mxu0 %vm412_vm2, %v405_v34 }
  0xf0   : > { %2565 = vmatprep.mubr.msk.bf16.mxu0 %vm412_vm2, %v406_v35 }
  0xf7   : > { %2566 = vmatmul.mubr.msk.bf16.gmra.mrb[52].mxu0 %vm412_vm2, %v407_v36 }
  0xf8   : > { %2569 = vmatprep.mubr.msk.bf16.mxu0 %vm412_vm2, %v408_v37 }
  0xff   : > { %2570 = vmatmul.mubr.msk.bf16.gmra.mrb[56].mxu0 %vm412_vm2, %v409_v38 }
 0x100   : > { %2573 = vmatprep.mubr.msk.bf16.mxu0 %vm412_vm2, %v410_v39 }
 0x107   : > { %2574 = vmatmul.mubr.msk.bf16.gmra.mrb[60].mxu0 %vm412_vm2, %v411_v40 }
 0x162   : > { %v2515_v44 = vpop.f32.mrb[0].mxu0 }
 0x163   : > { %v547_v45 = vpop.f32.mrb[1].mxu0 }
 0x164   : > { %v2516_v46 = vpop.f32.mrb[2].mxu0 }
 0x165   : > { %v803_v47 = vpack.c.bf16 %v2516_v46, %v2515_v44  ;;  %v550_v48 = vpop.f32.mrb[3].mxu0 }
 0x166   : > { %v802_v49 = vpack.c.bf16 %v550_v48, %v547_v45 }
 0x168   : > { %840 = vxpose.xlu0.c.b16.start [1/2] (short) (narrow) %v802_v49, 16 }
 0x16a   : > { %v2519_v50 = vpop.f32.mrb[4].mxu0 }
 0x16b   : > { %v563_v51 = vpop.f32.mrb[5].mxu0 }
 0x16c   : > { %841 = vxpose.xlu0.c.b16.end [2/2] (short) (narrow) %v803_v47, 16  ;;  %v2520_v52 = vpop.f32.mrb[6].mxu0 }
 0x16d   : > { %v805_v53 = vpack.c.bf16 %v2520_v52, %v2519_v50  ;;  %v566_v54 = vpop.f32.mrb[7].mxu0 }
 0x16e   : > { %v804_v55 = vpack.c.bf16 %v566_v54, %v563_v51 }
 0x170   : > { %921 = vxpose.xlu1.c.b16.start [1/2] (short) (narrow) %v804_v55, 16 }
 0x172   : > { %v2523_v56 = vpop.f32.mrb[8].mxu0 }
 0x173   : > { %v579_v57 = vpop.f32.mrb[9].mxu0 }
 0x174   : > { %922 = vxpose.xlu1.c.b16.end [2/2] (short) (narrow) %v805_v53, 16  ;;  %v2524_v58 = vpop.f32.mrb[10].mxu0 }
 0x175   : > { %v807_v59 = vpack.c.bf16 %v2524_v58, %v2523_v56  ;;  %v582_v60 = vpop.f32.mrb[11].mxu0 }
 0x176   : > { %v806_v61 = vpack.c.bf16 %v582_v60, %v579_v57 }
 0x178   : > { %988 = vxpose.xlu0.c.b16.start [1/2] (short) (narrow) %v806_v61, 16 }
 0x17a   : > { %v2527_v62 = vpop.f32.mrb[12].mxu0 }
 0x17b   : > { %v595_v63 = vpop.f32.mrb[13].mxu0 }
 0x17c   : > { %989 = vxpose.xlu0.c.b16.end [2/2] (short) (narrow) %v807_v59, 16  ;;  %v2528_v0 = vpop.f32.mrb[14].mxu0 }
 0x17d   : > { %v809_v1 = vpack.c.bf16 %v2528_v0, %v2527_v62  ;;  %v598_v2 = vpop.f32.mrb[15].mxu0 }
 0x17e   : > { %v808_v3 = vpack.c.bf16 %v598_v2, %v595_v63 }
 0x180   : > { %1055 = vxpose.xlu1.c.b16.start [1/2] (short) (narrow) %v808_v3, 16 }
 0x182   : > { %v2531_v4 = vpop.f32.mrb[16].mxu0 }
 0x183   : > { %v611_v5 = vpop.f32.mrb[17].mxu0 }
 0x184   : > { %1056 = vxpose.xlu1.c.b16.end [2/2] (short) (narrow) %v809_v1, 16  ;;  %v2532_v6 = vpop.f32.mrb[18].mxu0 }
 0x185   : > { %v811_v7 = vpack.c.bf16 %v2532_v6, %v2531_v4  ;;  %v614_v8 = vpop.f32.mrb[19].mxu0 }
 0x186   : > { %v810_v9 = vpack.c.bf16 %v614_v8, %v611_v5 }
 0x188   : > { %1122 = vxpose.xlu0.c.b16.start [1/2] (short) (narrow) %v810_v9, 16 }
 0x18a   : > { %v2535_v10 = vpop.f32.mrb[20].mxu0 }
 0x18b   : > { %v627_v11 = vpop.f32.mrb[21].mxu0 }
 0x18c   : > { %1123 = vxpose.xlu0.c.b16.end [2/2] (short) (narrow) %v811_v7, 16  ;;  %v2536_v12 = vpop.f32.mrb[22].mxu0 }
 0x18d   : > { %v813_v13 = vpack.c.bf16 %v2536_v12, %v2535_v10  ;;  %v630_v14 = vpop.f32.mrb[23].mxu0 }
 0x18e   : > { %v812_v15 = vpack.c.bf16 %v630_v14, %v627_v11 }
 0x190   : > { %1189 = vxpose.xlu1.c.b16.start [1/2] (short) (narrow) %v812_v15, 16 }
 0x192   : > { %v2539_v16 = vpop.f32.mrb[24].mxu0 }
 0x193   : > { %v643_v17 = vpop.f32.mrb[25].mxu0 }
 0x194   : > { %1190 = vxpose.xlu1.c.b16.end [2/2] (short) (narrow) %v813_v13, 16  ;;  %v2540_v18 = vpop.f32.mrb[26].mxu0 }
 0x195   : > { %v815_v19 = vpack.c.bf16 %v2540_v18, %v2539_v16  ;;  %v646_v20 = vpop.f32.mrb[27].mxu0 }
 0x196   : > { %v814_v21 = vpack.c.bf16 %v646_v20, %v643_v17 }
 0x198   : > { %1256 = vxpose.xlu0.c.b16.start [1/2] (short) (narrow) %v814_v21, 16 }
 0x19a   : > { %v2543_v22 = vpop.f32.mrb[28].mxu0 }
 0x19b   : > { %v659_v23 = vpop.f32.mrb[29].mxu0 }
 0x19c   : > { %1257 = vxpose.xlu0.c.b16.end [2/2] (short) (narrow) %v815_v19, 16  ;;  %v2544_v24 = vpop.f32.mrb[30].mxu0 }
 0x19d   : > { %v817_v25 = vpack.c.bf16 %v2544_v24, %v2543_v22  ;;  %v662_v26 = vpop.f32.mrb[31].mxu0 }
 0x19e   : > { %v816_v27 = vpack.c.bf16 %v662_v26, %v659_v23 }
 0x1a0   : > { %1323 = vxpose.xlu1.c.b16.start [1/2] (short) (narrow) %v816_v27, 16 }
 0x1a2   : > { %v2547_v28 = vpop.f32.mrb[32].mxu0 }
 0x1a3   : > { %v675_v29 = vpop.f32.mrb[33].mxu0 }
 0x1a4   : > { %1324 = vxpose.xlu1.c.b16.end [2/2] (short) (narrow) %v817_v25, 16  ;;  %v2548_v30 = vpop.f32.mrb[34].mxu0 }
 0x1a5   : > { %v819_v31 = vpack.c.bf16 %v2548_v30, %v2547_v28  ;;  %v678_v32 = vpop.f32.mrb[35].mxu0 }
 0x1a6   : > { %v818_v33 = vpack.c.bf16 %v678_v32, %v675_v29 }
 0x1a8   : > { %1390 = vxpose.xlu0.c.b16.start [1/2] (short) (narrow) %v818_v33, 16  ;;  %v839_v33 = vld [vmem:[#allocation2 + $0x8] sm:$0xff] }
 0x1aa   : > { %v2551_v34 = vpop.f32.mrb[36].mxu0 }
 0x1ab   : > { %v691_v35 = vpop.f32.mrb[37].mxu0 }
 0x1ac   : > { %1391 = vxpose.xlu0.c.b16.end [2/2] (short) (narrow) %v819_v31, 16  ;;  %v2552_v36 = vpop.f32.mrb[38].mxu0  ;;  %v838_v31 = vld [vmem:[#allocation2] sm:$0xff] }
 0x1ad   : > { %v821_v37 = vpack.c.bf16 %v2552_v36, %v2551_v34  ;;  %v694_v38 = vpop.f32.mrb[39].mxu0 }
 0x1ae   : > { %v820_v39 = vpack.c.bf16 %v694_v38, %v691_v35  ;;  %v919_v38 = vld [vmem:[#allocation2 + $0x10] sm:$0xff] }
 0x1b0   : > { %1457 = vxpose.xlu1.c.b16.start [1/2] (short) (narrow) %v820_v39, 16  ;;  %v920_v39 = vld [vmem:[#allocation2 + $0x18] sm:$0xff] }
 0x1b2   : > { %v2555_v40 = vpop.f32.mrb[40].mxu0 }
 0x1b3   : > { %v707_v44 = vpop.f32.mrb[41].mxu0 }
 0x1b4   : > { %1458 = vxpose.xlu1.c.b16.end [2/2] (short) (narrow) %v821_v37, 16  ;;  %v2556_v45 = vpop.f32.mrb[42].mxu0 }
 0x1b5   : > { %v823_v46 = vpack.c.bf16 %v2556_v45, %v2555_v40  ;;  %v710_v47 = vpop.f32.mrb[43].mxu0 }
 0x1b6   : > { %v822_v48 = vpack.c.bf16 %v710_v47, %v707_v44  ;;  %v986_v47 = vld [vmem:[#allocation2 + $0x20] sm:$0xff] }
 0x1b8   : > { %1524 = vxpose.xlu0.c.b16.start [1/2] (short) (narrow) %v822_v48, 16 }
 0x1ba   : > { %v2559_v49 = vpop.f32.mrb[44].mxu0 }
 0x1bb   : > { %v723_v50 = vpop.f32.mrb[45].mxu0 }
 0x1bc   : > { %1525 = vxpose.xlu0.c.b16.end [2/2] (short) (narrow) %v823_v46, 16  ;;  %v2560_v51 = vpop.f32.mrb[46].mxu0 }
 0x1bd   : > { %v825_v52 = vpack.c.bf16 %v2560_v51, %v2559_v49  ;;  %v726_v53 = vpop.f32.mrb[47].mxu0  ;;  %v987_v49 = vld [vmem:[#allocation2 + $0x28] sm:$0xff] }
 0x1be   : > { %v824_v54 = vpack.c.bf16 %v726_v53, %v723_v50 }
 0x1c0   : > { %1591 = vxpose.xlu1.c.b16.start [1/2] (short) (narrow) %v824_v54, 16 }
 0x1c2   : > { %v2563_v55 = vpop.f32.mrb[48].mxu0 }
 0x1c3   : > { %v739_v56 = vpop.f32.mrb[49].mxu0 }
 0x1c4   : > { %1592 = vxpose.xlu1.c.b16.end [2/2] (short) (narrow) %v825_v52, 16  ;;  %v2564_v57 = vpop.f32.mrb[50].mxu0 }
 0x1c5   : > { %v827_v58 = vpack.c.bf16 %v2564_v57, %v2563_v55  ;;  %v742_v59 = vpop.f32.mrb[51].mxu0  ;;  %v1053_v55 = vld [vmem:[#allocation2 + $0x30] sm:$0xff]  ;;  %v1054_v57 = vld [vmem:[#allocation2 + $0x38] sm:$0xff] }
 0x1c6   : > { %v826_v60 = vpack.c.bf16 %v742_v59, %v739_v56 }
 0x1c8   : > { %1658 = vxpose.xlu0.c.b16.start [1/2] (short) (narrow) %v826_v60, 16 }
 0x1ca   : > { %v2567_v61 = vpop.f32.mrb[52].mxu0 }
 0x1cb   : > { %v755_v62 = vpop.f32.mrb[53].mxu0 }
 0x1cc   : > { %1659 = vxpose.xlu0.c.b16.end [2/2] (short) (narrow) %v827_v58, 16  ;;  %v2568_v63 = vpop.f32.mrb[54].mxu0 }
 0x1cd   : > { %v829_v0 = vpack.c.bf16 %v2568_v63, %v2567_v61  ;;  %v758_v1 = vpop.f32.mrb[55].mxu0  ;;  %v1120_v63 = vld [vmem:[#allocation2 + $0x40] sm:$0xff] }
 0x1ce   : > { %v828_v2 = vpack.c.bf16 %v758_v1, %v755_v62  ;;  %v848_v3 = vpop.trf.xlu0  ;;  %v1121_v1 = vld [vmem:[#allocation2 + $0x48] sm:$0xff] }
 0x1cf   : > { %2582 = vmatmul.mubr.msk.bf16.vlgmr.msra.gmra.mrb[0].mxu1 %vm868_vm4, %v848_v3 }
 0x1d0   : > { %2586 = vmatpush3.bf16.msra.mxu1 %v2949_v41  ;;  %1725 = vxpose.xlu1.c.b16.start [1/2] (short) (narrow) %v828_v2, 16 }
 0x1d1   : > { %2587 = vmatprep.subr.bf16.mxu1 %v2807_v42  ;;  %2589 = vmatprep.mubr.msk.bf16.mxu1 %vm2808_vm3, %v2807_v42 }
 0x1d2   : > { %v2571_v4 = vpop.f32.mrb[56].mxu0 }
 0x1d3   : > { %v771_v5 = vpop.f32.mrb[57].mxu0 }
 0x1d4   : > { %2588 = vmatpush3.bf16.msra.mxu1 %v2955_v43  ;;  %1726 = vxpose.xlu1.c.b16.end [2/2] (short) (narrow) %v829_v0, 16  ;;  %v2572_v6 = vpop.f32.mrb[58].mxu0 }
 0x1d5   : > { %v831_v7 = vpack.c.bf16 %v2572_v6, %v2571_v4  ;;  %v774_v8 = vpop.f32.mrb[59].mxu0  ;;  %2593 = vmatprep.subr.bf16.mxu1 %v2807_v42 }
 0x1d6   : > { %v830_v9 = vpack.c.bf16 %v774_v8, %v771_v5  ;;  %v929_v10 = vpop.trf.xlu1 }
 0x1d7   : > { %2590 = vmatmul.mubr.msk.bf16.vlgmr.msra.gmra.mrb[4].mxu1 %vm868_vm4, %v929_v10 }
 0x1d8   : > { %2594 = vmatpush3.bf16.msra.mxu1 %v2949_v41  ;;  %1792 = vxpose.xlu0.c.b16.start [1/2] (short) (narrow) %v830_v9, 16  ;;  %v1188_v9 = vld [vmem:[#allocation2 + $0x58] sm:$0xff] }
 0x1d9   : > { %2595 = vmatprep.subr.bf16.mxu1 %v2807_v42  ;;  %2597 = vmatprep.mubr.msk.bf16.mxu1 %vm2808_vm3, %v2807_v42 }
 0x1da   : > { %v2575_v11 = vpop.f32.mrb[60].mxu0 }
 0x1db   : > { %v787_v12 = vpop.f32.mrb[61].mxu0 }
 0x1dc   : > { %2596 = vmatpush3.bf16.msra.mxu1 %v2955_v43  ;;  %1793 = vxpose.xlu0.c.b16.end [2/2] (short) (narrow) %v831_v7, 16  ;;  %v2576_v13 = vpop.f32.mrb[62].mxu0  ;;  %v1187_v7 = vld [vmem:[#allocation2 + $0x50] sm:$0xff] }
 0x1dd   : > { %v833_v14 = vpack.c.bf16 %v2576_v13, %v2575_v11  ;;  %v790_v15 = vpop.f32.mrb[63].mxu0  ;;  %2601 = vmatprep.subr.bf16.mxu1 %v2807_v42 }
 0x1de   : > { %v832_v16 = vpack.c.bf16 %v790_v15, %v787_v12  ;;  %v996_v17 = vpop.trf.xlu0  ;;  %v1254_v15 = vld [vmem:[#allocation2 + $0x60] sm:$0xff] }
 0x1df   : > { %2598 = vmatmul.mubr.msk.bf16.vlgmr.msra.gmra.mrb[8].mxu1 %vm868_vm4, %v996_v17  ;;  %v1255_v17 = vld [vmem:[#allocation2 + $0x68] sm:$0xff] }
 0x1e0   : > { %2602 = vmatpush3.bf16.msra.mxu1 %v2949_v41  ;;  %1859 = vxpose.xlu1.c.b16.start [1/2] (short) (narrow) %v832_v16, 16 }
 0x1e1   : > { %2603 = vmatprep.subr.bf16.mxu1 %v2807_v42  ;;  %2605 = vmatprep.mubr.msk.bf16.mxu1 %vm2808_vm3, %v2807_v42 }
 0x1e4   : > { %2604 = vmatpush3.bf16.msra.mxu1 %v2955_v43  ;;  %1860 = vxpose.xlu1.c.b16.end [2/2] (short) (narrow) %v833_v14, 16 }
 0x1e5   : > { %2609 = vmatprep.subr.bf16.mxu1 %v2807_v42 }
 0x1e6   : > { %v1063_v18 = vpop.trf.xlu1 }
 0x1e7   : > { %2606 = vmatmul.mubr.msk.bf16.vlgmr.msra.gmra.mrb[12].mxu1 %vm868_vm4, %v1063_v18 }
 0x1e8   : > { %2610 = vmatpush3.bf16.msra.mxu1 %v2949_v41  ;;  %2613 = vmatprep.mubr.msk.bf16.mxu1 %vm2808_vm3, %v2807_v42 }
 0x1e9   : > { %2611 = vmatprep.subr.bf16.mxu1 %v2807_v42 }
 0x1ec   : > { %2612 = vmatpush3.bf16.msra.mxu1 %v2955_v43 }
 0x1ed   : > { %2617 = vmatprep.subr.bf16.mxu1 %v2807_v42 }
 0x1ee   : > { %v1130_v19 = vpop.trf.xlu0 }
 0x1ef   : > { %2614 = vmatmul.mubr.msk.bf16.vlgmr.msra.gmra.mrb[16].mxu1 %vm868_vm4, %v1130_v19 }
 0x1f0   : > { %2618 = vmatpush3.bf16.msra.mxu1 %v2949_v41  ;;  %2621 = vmatprep.mubr.msk.bf16.mxu1 %vm2808_vm3, %v2807_v42 }
 0x1f1   : > { %2619 = vmatprep.subr.bf16.mxu1 %v2807_v42 }
 0x1f4   : > { %2620 = vmatpush3.bf16.msra.mxu1 %v2955_v43 }
 0x1f5   : > { %2625 = vmatprep.subr.bf16.mxu1 %v2807_v42 }
 0x1f6   : > { %v1197_v20 = vpop.trf.xlu1 }
 0x1f7   : > { %2622 = vmatmul.mubr.msk.bf16.vlgmr.msra.gmra.mrb[20].mxu1 %vm868_vm4, %v1197_v20 }
 0x1f8   : > { %2626 = vmatpush3.bf16.msra.mxu1 %v2949_v41  ;;  %2629 = vmatprep.mubr.msk.bf16.mxu1 %vm2808_vm3, %v2807_v42 }
 0x1f9   : > { %2627 = vmatprep.subr.bf16.mxu1 %v2807_v42 }
 0x1fc   : > { %2628 = vmatpush3.bf16.msra.mxu1 %v2955_v43 }
 0x1fd   : > { %2633 = vmatprep.subr.bf16.mxu1 %v2807_v42 }
 0x1fe   : > { %v1264_v21 = vpop.trf.xlu0 }
 0x1ff   : > { %2630 = vmatmul.mubr.msk.bf16.vlgmr.msra.gmra.mrb[24].mxu1 %vm868_vm4, %v1264_v21 }
 0x200   : > { %2634 = vmatpush3.bf16.msra.mxu1 %v2949_v41  ;;  %2637 = vmatprep.mubr.msk.bf16.mxu1 %vm2808_vm3, %v2807_v42 }
 0x201   : > { %2635 = vmatprep.subr.bf16.mxu1 %v2807_v42 }
 0x204   : > { %2636 = vmatpush3.bf16.msra.mxu1 %v2955_v43 }
 0x205   : > { %2641 = vmatprep.subr.bf16.mxu1 %v2807_v42 }
 0x206   : > { %v1331_v22 = vpop.trf.xlu1 }
 0x207   : > { %2638 = vmatmul.mubr.msk.bf16.vlgmr.msra.gmra.mrb[28].mxu1 %vm868_vm4, %v1331_v22 }
 0x208   : > { %2642 = vmatpush3.bf16.msra.mxu1 %v2949_v41  ;;  %2645 = vmatprep.mubr.msk.bf16.mxu1 %vm2808_vm3, %v2807_v42 }
 0x209   : > { %2643 = vmatprep.subr.bf16.mxu1 %v2807_v42 }
 0x20c   : > { %2644 = vmatpush3.bf16.msra.mxu1 %v2955_v43 }
 0x20d   : > { %2649 = vmatprep.subr.bf16.mxu1 %v2807_v42 }
 0x20e   : > { %v1398_v23 = vpop.trf.xlu0 }
 0x20f   : > { %2646 = vmatmul.mubr.msk.bf16.vlgmr.msra.gmra.mrb[32].mxu1 %vm868_vm4, %v1398_v23  ;;  %v1321_v23 = vld [vmem:[#allocation2 + $0x70] sm:$0xff] }
 0x210   : > { %2650 = vmatpush3.bf16.msra.mxu1 %v2949_v41  ;;  %2653 = vmatprep.mubr.msk.bf16.mxu1 %vm2808_vm3, %v2807_v42 }
 0x211   : > { %2651 = vmatprep.subr.bf16.mxu1 %v2807_v42 }
 0x214   : > { %2652 = vmatpush3.bf16.msra.mxu1 %v2955_v43 }
 0x215   : > { %2657 = vmatprep.subr.bf16.mxu1 %v2807_v42 }
 0x216   : > { %v1465_v24 = vpop.trf.xlu1 }
 0x217   : > { %2654 = vmatmul.mubr.msk.bf16.vlgmr.msra.gmra.mrb[36].mxu1 %vm868_vm4, %v1465_v24 }
 0x218   : > { %2658 = vmatpush3.bf16.msra.mxu1 %v2949_v41  ;;  %2661 = vmatprep.mubr.msk.bf16.mxu1 %vm2808_vm3, %v2807_v42 }
 0x219   : > { %2659 = vmatprep.subr.bf16.mxu1 %v2807_v42 }
 0x21c   : > { %2660 = vmatpush3.bf16.msra.mxu1 %v2955_v43 }
 0x21d   : > { %2665 = vmatprep.subr.bf16.mxu1 %v2807_v42 }
 0x21e   : > { %v1532_v25 = vpop.trf.xlu0 }
 0x21f   : > { %2662 = vmatmul.mubr.msk.bf16.vlgmr.msra.gmra.mrb[40].mxu1 %vm868_vm4, %v1532_v25  ;;  %v1322_v25 = vld [vmem:[#allocation2 + $0x78] sm:$0xff] }
 0x220   : > { %2666 = vmatpush3.bf16.msra.mxu1 %v2949_v41  ;;  %2669 = vmatprep.mubr.msk.bf16.mxu1 %vm2808_vm3, %v2807_v42 }
 0x221   : > { %2667 = vmatprep.subr.bf16.mxu1 %v2807_v42 }
 0x224   : > { %2668 = vmatpush3.bf16.msra.mxu1 %v2955_v43 }
 0x225   : > { %2673 = vmatprep.subr.bf16.mxu1 %v2807_v42 }
 0x226   : > { %v1599_v26 = vpop.trf.xlu1 }
 0x227   : > { %2670 = vmatmul.mubr.msk.bf16.vlgmr.msra.gmra.mrb[44].mxu1 %vm868_vm4, %v1599_v26 }
 0x228   : > { %2674 = vmatpush3.bf16.msra.mxu1 %v2949_v41  ;;  %2677 = vmatprep.mubr.msk.bf16.mxu1 %vm2808_vm3, %v2807_v42 }
 0x229   : > { %2675 = vmatprep.subr.bf16.mxu1 %v2807_v42 }
 0x22c   : > { %2676 = vmatpush3.bf16.msra.mxu1 %v2955_v43 }
 0x22d   : > { %2681 = vmatprep.subr.bf16.mxu1 %v2807_v42 }
 0x22e   : > { %v1666_v27 = vpop.trf.xlu0 }
 0x22f   : > { %2678 = vmatmul.mubr.msk.bf16.vlgmr.msra.gmra.mrb[48].mxu1 %vm868_vm4, %v1666_v27 }
 0x230   : > { %2682 = vmatpush3.bf16.msra.mxu1 %v2949_v41  ;;  %2685 = vmatprep.mubr.msk.bf16.mxu1 %vm2808_vm3, %v2807_v42 }
 0x231   : > { %2683 = vmatprep.subr.bf16.mxu1 %v2807_v42 }
 0x234   : > { %2684 = vmatpush3.bf16.msra.mxu1 %v2955_v43 }
 0x235   : > { %2689 = vmatprep.subr.bf16.mxu1 %v2807_v42 }
 0x236   : > { %v1733_v28 = vpop.trf.xlu1 }
 0x237   : > { %2686 = vmatmul.mubr.msk.bf16.vlgmr.msra.gmra.mrb[52].mxu1 %vm868_vm4, %v1733_v28 }
 0x238   : > { %2690 = vmatpush3.bf16.msra.mxu1 %v2949_v41  ;;  %2693 = vmatprep.mubr.msk.bf16.mxu1 %vm2808_vm3, %v2807_v42 }
 0x239   : > { %2691 = vmatprep.subr.bf16.mxu1 %v2807_v42 }
 0x23c   : > { %2692 = vmatpush3.bf16.msra.mxu1 %v2955_v43 }
 0x23d   : > { %2697 = vmatprep.subr.bf16.mxu1 %v2807_v42 }
 0x23e   : > { %v1800_v29 = vpop.trf.xlu0 }
 0x23f   : > { %2694 = vmatmul.mubr.msk.bf16.vlgmr.msra.gmra.mrb[56].mxu1 %vm868_vm4, %v1800_v29 }
 0x240   : > { %2698 = vmatpush3.bf16.msra.mxu1 %v2949_v41  ;;  %2701 = vmatprep.mubr.msk.bf16.mxu1 %vm2808_vm3, %v2807_v42 }
 0x241   : > { %2699 = vmatprep.subr.bf16.mxu1 %v2807_v42 }
 0x244   : > { %2700 = vmatpush3.bf16.msra.mxu1 %v2955_v43 }
 0x246   : > { %v1867_v30 = vpop.trf.xlu1 }
 0x247   : > { %2702 = vmatmul.mubr.msk.bf16.vlgmr.msra.gmra.mrb[60].mxu1 %vm868_vm4, %v1867_v30 }
 0x2a2   : > { %v906_v32 = vpop.f32.mrb[0].mxu1 }
 0x2a3   : > { %v913_v34 = vadd.f32 %v906_v32, %v838_v31  ;;  %v2583_v35 = vpop.f32.mrb[1].mxu1  ;;  %v1388_v31 = vld [vmem:[#allocation2 + $0x80] sm:$0xff] }
 0x2a4   : > { %v909_v36 = vpop.f32.mrb[2].mxu1 }
 0x2a5   : > { %916 = vst.msk [vmem:[#allocation2] sm:$0xff] %vm915_vm5, %v913_v34  ;;  %v914_v41 = vadd.f32 %v909_v36, %v839_v33  ;;  %v2584_v37 = vpop.f32.mrb[3].mxu1  ;;  %v1389_v33 = vld [vmem:[#allocation2 + $0x88] sm:$0xff] }
 0x2a7   : > { %917 = vst.msk [vmem:[#allocation2 + $0x8] sm:$0xff] %vm915_vm5, %v914_v41 }
 0x2aa   : > { %v974_v42 = vpop.f32.mrb[4].mxu1 }
 0x2ab   : > { %v981_v43 = vadd.f32 %v974_v42, %v919_v38  ;;  %v2591_v40 = vpop.f32.mrb[5].mxu1  ;;  %v1455_v38 = vld [vmem:[#allocation2 + $0x90] sm:$0xff] }
 0x2ac   : > { %v977_v44 = vpop.f32.mrb[6].mxu1 }
 0x2ad   : > { %983 = vst.msk [vmem:[#allocation2 + $0x10] sm:$0xff] %vm915_vm5, %v981_v43  ;;  %v982_v45 = vadd.f32 %v977_v44, %v920_v39  ;;  %v2592_v46 = vpop.f32.mrb[7].mxu1  ;;  %v1456_v39 = vld [vmem:[#allocation2 + $0x98] sm:$0xff] }
 0x2af   : > { %984 = vst.msk [vmem:[#allocation2 + $0x18] sm:$0xff] %vm915_vm5, %v982_v45 }
 0x2b2   : > { %v1041_v48 = vpop.f32.mrb[8].mxu1 }
 0x2b3   : > { %v1048_v50 = vadd.f32 %v1041_v48, %v986_v47  ;;  %v2599_v51 = vpop.f32.mrb[9].mxu1  ;;  %v1522_v47 = vld [vmem:[#allocation2 + $0xa0] sm:$0xff] }
 0x2b4   : > { %v1044_v52 = vpop.f32.mrb[10].mxu1 }
 0x2b5   : > { %1050 = vst.msk [vmem:[#allocation2 + $0x20] sm:$0xff] %vm915_vm5, %v1048_v50  ;;  %v1049_v53 = vadd.f32 %v1044_v52, %v987_v49  ;;  %v2600_v54 = vpop.f32.mrb[11].mxu1  ;;  %v1523_v49 = vld [vmem:[#allocation2 + $0xa8] sm:$0xff] }
 0x2b7   : > { %1051 = vst.msk [vmem:[#allocation2 + $0x28] sm:$0xff] %vm915_vm5, %v1049_v53 }
 0x2ba   : > { %v1108_v56 = vpop.f32.mrb[12].mxu1 }
 0x2bb   : > { %v1115_v58 = vadd.f32 %v1108_v56, %v1053_v55  ;;  %v2607_v59 = vpop.f32.mrb[13].mxu1  ;;  %v1589_v55 = vld [vmem:[#allocation2 + $0xb0] sm:$0xff] }
 0x2bc   : > { %v1111_v60 = vpop.f32.mrb[14].mxu1 }
 0x2bd   : > { %1117 = vst.msk [vmem:[#allocation2 + $0x30] sm:$0xff] %vm915_vm5, %v1115_v58  ;;  %v1116_v61 = vadd.f32 %v1111_v60, %v1054_v57  ;;  %v2608_v62 = vpop.f32.mrb[15].mxu1  ;;  %v1590_v57 = vld [vmem:[#allocation2 + $0xb8] sm:$0xff] }
 0x2bf   : > { %1118 = vst.msk [vmem:[#allocation2 + $0x38] sm:$0xff] %vm915_vm5, %v1116_v61 }
 0x2c2   : > { %v1175_v0 = vpop.f32.mrb[16].mxu1 }
 0x2c3   : > { %v1182_v2 = vadd.f32 %v1175_v0, %v1120_v63  ;;  %v2615_v3 = vpop.f32.mrb[17].mxu1  ;;  %v1656_v63 = vld [vmem:[#allocation2 + $0xc0] sm:$0xff] }
 0x2c4   : > { %v1178_v4 = vpop.f32.mrb[18].mxu1 }
 0x2c5   : > { %1184 = vst.msk [vmem:[#allocation2 + $0x40] sm:$0xff] %vm915_vm5, %v1182_v2  ;;  %v1183_v5 = vadd.f32 %v1178_v4, %v1121_v1  ;;  %v2616_v6 = vpop.f32.mrb[19].mxu1  ;;  %v1657_v1 = vld [vmem:[#allocation2 + $0xc8] sm:$0xff] }
 0x2c7   : > { %1185 = vst.msk [vmem:[#allocation2 + $0x48] sm:$0xff] %vm915_vm5, %v1183_v5 }
 0x2ca   : > { %v1242_v8 = vpop.f32.mrb[20].mxu1 }
 0x2cb   : > { %v1249_v10 = vadd.f32 %v1242_v8, %v1187_v7  ;;  %v2623_v11 = vpop.f32.mrb[21].mxu1  ;;  %v1723_v7 = vld [vmem:[#allocation2 + $0xd0] sm:$0xff] }
 0x2cc   : > { %v1245_v12 = vpop.f32.mrb[22].mxu1 }
 0x2cd   : > { %1251 = vst.msk [vmem:[#allocation2 + $0x50] sm:$0xff] %vm915_vm5, %v1249_v10  ;;  %v1250_v13 = vadd.f32 %v1245_v12, %v1188_v9  ;;  %v2624_v14 = vpop.f32.mrb[23].mxu1  ;;  %v1724_v9 = vld [vmem:[#allocation2 + $0xd8] sm:$0xff] }
 0x2cf   : > { %1252 = vst.msk [vmem:[#allocation2 + $0x58] sm:$0xff] %vm915_vm5, %v1250_v13 }
 0x2d2   : > { %v1309_v16 = vpop.f32.mrb[24].mxu1 }
 0x2d3   : > { %v1316_v18 = vadd.f32 %v1309_v16, %v1254_v15  ;;  %v2631_v19 = vpop.f32.mrb[25].mxu1  ;;  %v1790_v15 = vld [vmem:[#allocation2 + $0xe0] sm:$0xff] }
 0x2d4   : > { %v1312_v20 = vpop.f32.mrb[26].mxu1 }
 0x2d5   : > { %1318 = vst.msk [vmem:[#allocation2 + $0x60] sm:$0xff] %vm915_vm5, %v1316_v18  ;;  %v1317_v21 = vadd.f32 %v1312_v20, %v1255_v17  ;;  %v2632_v22 = vpop.f32.mrb[27].mxu1  ;;  %v1791_v17 = vld [vmem:[#allocation2 + $0xe8] sm:$0xff] }
 0x2d7   : > { %1319 = vst.msk [vmem:[#allocation2 + $0x68] sm:$0xff] %vm915_vm5, %v1317_v21 }
 0x2da   : > { %v1376_v24 = vpop.f32.mrb[28].mxu1 }
 0x2db   : > { %v1383_v26 = vadd.f32 %v1376_v24, %v1321_v23  ;;  %v2639_v27 = vpop.f32.mrb[29].mxu1  ;;  %v1857_v23 = vld [vmem:[#allocation2 + $0xf0] sm:$0xff] }
 0x2dc   : > { %v1379_v28 = vpop.f32.mrb[30].mxu1 }
 0x2dd   : > { %1385 = vst.msk [vmem:[#allocation2 + $0x70] sm:$0xff] %vm915_vm5, %v1383_v26  ;;  %v1384_v29 = vadd.f32 %v1379_v28, %v1322_v25  ;;  %v2640_v30 = vpop.f32.mrb[31].mxu1  ;;  %v1858_v25 = vld [vmem:[#allocation2 + $0xf8] sm:$0xff] }
 0x2df   : > { %1386 = vst.msk [vmem:[#allocation2 + $0x78] sm:$0xff] %vm915_vm5, %v1384_v29 }
 0x2e2   : > { %v1443_v32 = vpop.f32.mrb[32].mxu1 }
 0x2e3   : > { %v1450_v34 = vadd.f32 %v1443_v32, %v1388_v31  ;;  %v2647_v35 = vpop.f32.mrb[33].mxu1  ;;  %v2000_v31 = vld [vmem:[%s3305_s4 + $0x10] sm:$0xff] (!%p2423_p6)  ;;  %v1998_v32 = vld [vmem:[%s3305_s4] sm:$0xff] (!%p2423_p6) }
 0x2e4   : > { %v1446_v36 = vpop.f32.mrb[34].mxu1  ;;  %v1999_v35 = vld [vmem:[%s3305_s4 + $0x8] sm:$0xff] (!%p2423_p6) }
 0x2e5   : > { %1452 = vst.msk [vmem:[#allocation2 + $0x80] sm:$0xff] %vm915_vm5, %v1450_v34  ;;  %v1451_v41 = vadd.f32 %v1446_v36, %v1389_v33  ;;  %v2648_v37 = vpop.f32.mrb[35].mxu1  ;;  %v2809_v33 = vmov (!%p2423_p6), 0   ;;  %v2001_v34 = vld [vmem:[%s3305_s4 + $0x18] sm:$0xff] (!%p2423_p6)  ;;  %v2003_v36 = vld [vmem:[%s3305_s4 + $0x28] sm:$0xff] (!%p2423_p6) }
 0x2e6   : > { %2751 = vset.pattern.permute.xlu1 (!%p2423_p6), %v2809_v33  ;;  %2750 = vset.pattern.permute.xlu0 (!%p2423_p6), %v2809_v33  ;;  %v2005_v37 = vld [vmem:[%s3305_s4 + $0x38] sm:$0xff] (!%p2423_p6) }
 0x2e7   : > { %1453 = vst.msk [vmem:[#allocation2 + $0x88] sm:$0xff] %vm915_vm5, %v1451_v41  ;;  %2042 = vperm.xlu1 (!%p2423_p6), %2751, %v2000_v31   ;;  %2032 = vperm.xlu0 (!%p2423_p6), %2750, %v1998_v32   ;;  %v2002_v41 = vld [vmem:[%s3305_s4 + $0x20] sm:$0xff] (!%p2423_p6) }
 0x2ea   : > { %v1510_v42 = vpop.f32.mrb[36].mxu1 }
 0x2eb   : > { %v1517_v43 = vadd.f32 %v1510_v42, %v1455_v38  ;;  %v2655_v40 = vpop.f32.mrb[37].mxu1  ;;  %2047 = vperm.xlu1 (!%p2423_p6), %2751, %v2001_v34   ;;  %2037 = vperm.xlu0 (!%p2423_p6), %2750, %v1999_v35   ;;  %v2004_v38 = vld [vmem:[%s3305_s4 + $0x30] sm:$0xff] (!%p2423_p6)  ;;  %v2007_v42 = vld [vmem:[%s3305_s4 + $0x48] sm:$0xff] (!%p2423_p6) }
 0x2ec   : > { %v1513_v44 = vpop.f32.mrb[38].mxu1  ;;  %v2008_v40 = vld [vmem:[%s3305_s4 + $0x50] sm:$0xff] (!%p2423_p6) }
 0x2ed   : > { %1519 = vst.msk [vmem:[#allocation2 + $0x90] sm:$0xff] %vm915_vm5, %v1517_v43  ;;  %v1518_v45 = vadd.f32 %v1513_v44, %v1456_v39  ;;  %v2656_v46 = vpop.f32.mrb[39].mxu1  ;;  %v2006_v39 = vld [vmem:[%s3305_s4 + $0x40] sm:$0xff] (!%p2423_p6)  ;;  %v2009_v43 = vld [vmem:[%s3305_s4 + $0x58] sm:$0xff] (!%p2423_p6)  ;;  %v2011_v44 = vld [vmem:[%s3305_s4 + $0x68] sm:$0xff] (!%p2423_p6) }
 0x2ee   : > { %v2013_v46 = vld [vmem:[%s3305_s4 + $0x78] sm:$0xff] (!%p2423_p6) }
 0x2ef   : > { %1520 = vst.msk [vmem:[#allocation2 + $0x98] sm:$0xff] %vm915_vm5, %v1518_v45  ;;  %2057 = vperm.xlu1 (!%p2423_p6), %2751, %v2003_v36   ;;  %2052 = vperm.xlu0 (!%p2423_p6), %2750, %v2002_v41   ;;  %v2010_v45 = vld [vmem:[%s3305_s4 + $0x60] sm:$0xff] (!%p2423_p6)  ;;  %v1938_v41 = vld [vmem:[#allocation2 + $0x58] sm:$0xff] (!%p2423_p6) }
 0x2f2   : > { %v1577_v48 = vpop.f32.mrb[40].mxu1 }
 0x2f3   : > { %v1584_v50 = vadd.f32 %v1577_v48, %v1522_v47  ;;  %v2663_v51 = vpop.f32.mrb[41].mxu1  ;;  %2067 = vperm.xlu1 (!%p2423_p6), %2751, %v2005_v37   ;;  %2062 = vperm.xlu0 (!%p2423_p6), %2750, %v2004_v38   ;;  %v2012_v47 = vld [vmem:[%s3305_s4 + $0x70] sm:$0xff] (!%p2423_p6)  ;;  %v2015_v48 = vld [vmem:[%s3305_s4 + $0x88] sm:$0xff] (!%p2423_p6) }
 0x2f4   : > { %v1580_v52 = vpop.f32.mrb[42].mxu1  ;;  %v2016_v51 = vld [vmem:[%s3305_s4 + $0x90] sm:$0xff] (!%p2423_p6) }
 0x2f5   : > { %1586 = vst.msk [vmem:[#allocation2 + $0xa0] sm:$0xff] %vm915_vm5, %v1584_v50  ;;  %v1585_v53 = vadd.f32 %v1580_v52, %v1523_v49  ;;  %v2664_v54 = vpop.f32.mrb[43].mxu1  ;;  %v2014_v49 = vld [vmem:[%s3305_s4 + $0x80] sm:$0xff] (!%p2423_p6)  ;;  %v2017_v50 = vld [vmem:[%s3305_s4 + $0x98] sm:$0xff] (!%p2423_p6)  ;;  %v2019_v52 = vld [vmem:[%s3305_s4 + $0xa8] sm:$0xff] (!%p2423_p6) }
 0x2f6   : > { %v2021_v54 = vld [vmem:[%s3305_s4 + $0xb8] sm:$0xff] (!%p2423_p6)  ;;  %v1937_v37 = vld [vmem:[#allocation2 + $0x50] sm:$0xff] (!%p2423_p6) }
 0x2f7   : > { %1587 = vst.msk [vmem:[#allocation2 + $0xa8] sm:$0xff] %vm915_vm5, %v1585_v53  ;;  %2077 = vperm.xlu1 (!%p2423_p6), %2751, %v2007_v42   ;;  %2072 = vperm.xlu0 (!%p2423_p6), %2750, %v2006_v39   ;;  %v2018_v53 = vld [vmem:[%s3305_s4 + $0xa0] sm:$0xff] (!%p2423_p6) }
 0x2fa   : > { %v1644_v56 = vpop.f32.mrb[44].mxu1 }
 0x2fb   : > { %v1651_v58 = vadd.f32 %v1644_v56, %v1589_v55  ;;  %v2671_v59 = vpop.f32.mrb[45].mxu1  ;;  %2087 = vperm.xlu1 (!%p2423_p6), %2751, %v2009_v43   ;;  %2082 = vperm.xlu0 (!%p2423_p6), %2750, %v2008_v40   ;;  %v2020_v55 = vld [vmem:[%s3305_s4 + $0xb0] sm:$0xff] (!%p2423_p6)  ;;  %v2023_v56 = vld [vmem:[%s3305_s4 + $0xc8] sm:$0xff] (!%p2423_p6) }
 0x2fc   : > { %v1647_v60 = vpop.f32.mrb[46].mxu1  ;;  %v2024_v59 = vld [vmem:[%s3305_s4 + $0xd0] sm:$0xff] (!%p2423_p6) }
 0x2fd   : > { %1653 = vst.msk [vmem:[#allocation2 + $0xb0] sm:$0xff] %vm915_vm5, %v1651_v58  ;;  %v1652_v61 = vadd.f32 %v1647_v60, %v1590_v57  ;;  %v2672_v62 = vpop.f32.mrb[47].mxu1  ;;  %v2022_v57 = vld [vmem:[%s3305_s4 + $0xc0] sm:$0xff] (!%p2423_p6)  ;;  %v2025_v58 = vld [vmem:[%s3305_s4 + $0xd8] sm:$0xff] (!%p2423_p6)  ;;  %v2027_v60 = vld [vmem:[%s3305_s4 + $0xe8] sm:$0xff] (!%p2423_p6) }
 0x2fe   : > { %v2029_v62 = vld [vmem:[%s3305_s4 + $0xf8] sm:$0xff] (!%p2423_p6) }
 0x2ff   : > { %1654 = vst.msk [vmem:[#allocation2 + $0xb8] sm:$0xff] %vm915_vm5, %v1652_v61  ;;  %2097 = vperm.xlu1 (!%p2423_p6), %2751, %v2011_v44   ;;  %2092 = vperm.xlu0 (!%p2423_p6), %2750, %v2010_v45   ;;  %v2026_v61 = vld [vmem:[%s3305_s4 + $0xe0] sm:$0xff] (!%p2423_p6)  ;;  %v1940_v45 = vld [vmem:[#allocation2 + $0x68] sm:$0xff] (!%p2423_p6) }
 0x302   : > { %v1711_v0 = vpop.f32.mrb[48].mxu1 }
 0x303   : > { %v1718_v2 = vadd.f32 %v1711_v0, %v1656_v63  ;;  %v2679_v3 = vpop.f32.mrb[49].mxu1  ;;  %2107 = vperm.xlu1 (!%p2423_p6), %2751, %v2013_v46   ;;  %2102 = vperm.xlu0 (!%p2423_p6), %2750, %v2012_v47   ;;  %v2028_v63 = vld [vmem:[%s3305_s4 + $0xf0] sm:$0xff] (!%p2423_p6)  ;;  %v1939_v46 = vld [vmem:[#allocation2 + $0x60] sm:$0xff] (!%p2423_p6) }
 0x304   : > { %v1714_v4 = vpop.f32.mrb[50].mxu1  ;;  %v1929_v0 = vld [vmem:[#allocation2 + $0x10] sm:$0xff] (!%p2423_p6) }
 0x305   : > { %1720 = vst.msk [vmem:[#allocation2 + $0xc0] sm:$0xff] %vm915_vm5, %v1718_v2  ;;  %v1719_v5 = vadd.f32 %v1714_v4, %v1657_v1  ;;  %v2680_v6 = vpop.f32.mrb[51].mxu1  ;;  %v3198_v1 = vld [vmem:[%s3304_s3] ss:$0 sm:$0xff] (!%p2423_p6) }
 0x306   : > { %v1927_v2 = vld [vmem:[#allocation2] sm:$0xff] (!%p2423_p6)  ;;  %v1968_v3 = vadd.f32 (!%p2423_p6), %v3198_v1, %v1929_v0  ;;  %v1928_v6 = vld [vmem:[#allocation2 + $0x8] sm:$0xff] (!%p2423_p6)  ;;  %v1977_v40 = vadd.f32 (!%p2423_p6), %v3198_v1, %v1938_v41  ;;  %v1976_v44 = vadd.f32 (!%p2423_p6), %v3198_v1, %v1937_v37 }
 0x307   : > { %1721 = vst.msk [vmem:[#allocation2 + $0xc8] sm:$0xff] %vm915_vm5, %v1719_v5  ;;  %2117 = vperm.xlu1 (!%p2423_p6), %2751, %v2015_v48   ;;  %2112 = vperm.xlu0 (!%p2423_p6), %2750, %v2014_v49   ;;  %v1966_v4 = vadd.f32 (!%p2423_p6), %v3198_v1, %v1927_v2  ;;  %v1930_v5 = vld [vmem:[#allocation2 + $0x18] sm:$0xff] (!%p2423_p6) }
 0x30a   : > { %v1778_v8 = vpop.f32.mrb[52].mxu1 }
 0x30b   : > { %v1785_v10 = vadd.f32 %v1778_v8, %v1723_v7  ;;  %v2687_v11 = vpop.f32.mrb[53].mxu1  ;;  %2127 = vperm.xlu1 (!%p2423_p6), %2751, %v2017_v50   ;;  %2122 = vperm.xlu0 (!%p2423_p6), %2750, %v2016_v51   ;;  %v1979_v51 = vadd.f32 (!%p2423_p6), %v3198_v1, %v1940_v45 }
 0x30c   : > { %v1781_v12 = vpop.f32.mrb[54].mxu1  ;;  %v1969_v11 = vadd.f32 (!%p2423_p6), %v3198_v1, %v1930_v5 }
 0x30d   : > { %1787 = vst.msk [vmem:[#allocation2 + $0xd0] sm:$0xff] %vm915_vm5, %v1785_v10  ;;  %v1786_v13 = vadd.f32 %v1781_v12, %v1724_v9  ;;  %v2688_v14 = vpop.f32.mrb[55].mxu1  ;;  %v1967_v12 = vadd.f32 (!%p2423_p6), %v3198_v1, %v1928_v6  ;;  %v1946_v6 = vld [vmem:[#allocation2 + $0x98] sm:$0xff] (!%p2423_p6) }
 0x30e   : > { %v1931_v14 = vld [vmem:[#allocation2 + $0x20] sm:$0xff] (!%p2423_p6) }
 0x30f   : > { %1788 = vst.msk [vmem:[#allocation2 + $0xd8] sm:$0xff] %vm915_vm5, %v1786_v13  ;;  %2137 = vperm.xlu1 (!%p2423_p6), %2751, %v2019_v52   ;;  %2132 = vperm.xlu0 (!%p2423_p6), %2750, %v2018_v53   ;;  %v1932_v13 = vld [vmem:[#allocation2 + $0x28] sm:$0xff] (!%p2423_p6)  ;;  %v1978_v52 = vadd.f32 (!%p2423_p6), %v3198_v1, %v1939_v46  ;;  %v1942_v53 = vld [vmem:[#allocation2 + $0x78] sm:$0xff] (!%p2423_p6) }
 0x312   : > { %v1845_v16 = vpop.f32.mrb[56].mxu1 }
 0x313   : > { %v1852_v18 = vadd.f32 %v1845_v16, %v1790_v15  ;;  %v2695_v19 = vpop.f32.mrb[57].mxu1  ;;  %2147 = vperm.xlu1 (!%p2423_p6), %2751, %v2021_v54   ;;  %2142 = vperm.xlu0 (!%p2423_p6), %2750, %v2020_v55   ;;  %v1941_v54 = vld [vmem:[#allocation2 + $0x70] sm:$0xff] (!%p2423_p6) }
 0x314   : > { %v1848_v20 = vpop.f32.mrb[58].mxu1  ;;  %v1971_v19 = vadd.f32 (!%p2423_p6), %v3198_v1, %v1932_v13 }
 0x315   : > { %1854 = vst.msk [vmem:[#allocation2 + $0xe0] sm:$0xff] %vm915_vm5, %v1852_v18  ;;  %v1853_v21 = vadd.f32 %v1848_v20, %v1791_v17  ;;  %v2696_v22 = vpop.f32.mrb[59].mxu1  ;;  %v1970_v20 = vadd.f32 (!%p2423_p6), %v3198_v1, %v1931_v14  ;;  %v1948_v14 = vld [vmem:[#allocation2 + $0xa8] sm:$0xff] (!%p2423_p6) }
 0x316   : > { %v1933_v22 = vld [vmem:[#allocation2 + $0x30] sm:$0xff] (!%p2423_p6)  ;;  %v1954_v37 = vld [vmem:[#allocation2 + $0xd8] sm:$0xff] (!%p2423_p6) }
 0x317   : > { %1855 = vst.msk [vmem:[#allocation2 + $0xe8] sm:$0xff] %vm915_vm5, %v1853_v21  ;;  %2157 = vperm.xlu1 (!%p2423_p6), %2751, %v2023_v56   ;;  %2152 = vperm.xlu0 (!%p2423_p6), %2750, %v2022_v57   ;;  %v1934_v21 = vld [vmem:[#allocation2 + $0x38] sm:$0xff] (!%p2423_p6) }
 0x319   : > { %1926 = sbr.rel (%p2423_p6) target bundleno = 934 (0x3a6), region = 48 }
 0x31a   : > { %v1912_v24 = vpop.f32.mrb[60].mxu1 }
 0x31b   : > { %v1919_v26 = vadd.f32 %v1912_v24, %v1857_v23  ;;  %v2703_v27 = vpop.f32.mrb[61].mxu1  ;;  %2167 = vperm.xlu1 (!%p2423_p6), %2751, %v2025_v58   ;;  %2162 = vperm.xlu0 (!%p2423_p6), %2750, %v2024_v59   ;;  %v1981_v59 = vadd.f32 (!%p2423_p6), %v3198_v1, %v1942_v53 }
 0x31c   : > { %v1915_v28 = vpop.f32.mrb[62].mxu1  ;;  %v1973_v27 = vadd.f32 (!%p2423_p6), %v3198_v1, %v1934_v21 }
 0x31d   : > { %1921 = vst.msk [vmem:[#allocation2 + $0xf0] sm:$0xff] %vm915_vm5, %v1919_v26  ;;  %v1920_v29 = vadd.f32 %v1915_v28, %v1858_v25  ;;  %v2704_v30 = vpop.f32.mrb[63].mxu1  ;;  %v1972_v28 = vadd.f32 (!%p2423_p6), %v3198_v1, %v1933_v22  ;;  %v1950_v22 = vld [vmem:[#allocation2 + $0xb8] sm:$0xff] (!%p2423_p6) }
 0x31e   : > { %v1935_v30 = vld [vmem:[#allocation2 + $0x40] sm:$0xff] (!%p2423_p6)  ;;  %v1956_v46 = vld [vmem:[#allocation2 + $0xe8] sm:$0xff] (!%p2423_p6) }
 0x31f   : > { %1922 = vst.msk [vmem:[#allocation2 + $0xf8] sm:$0xff] %vm915_vm5, %v1920_v29  ;;  %2177 = vperm.xlu1 (!%p2423_p6), %2751, %v2027_v60   ;;  %2172 = vperm.xlu0 (!%p2423_p6), %2750, %v2026_v61   ;;  %v1936_v29 = vld [vmem:[#allocation2 + $0x48] sm:$0xff] (!%p2423_p6)  ;;  %v1974_v36 = vadd.f32 (!%p2423_p6), %v3198_v1, %v1935_v30  ;;  %v1980_v60 = vadd.f32 (!%p2423_p6), %v3198_v1, %v1941_v54 }
 0x320   : > { %v1975_v35 = vadd.f32 %v3198_v1, %v1936_v29  ;;  %v1944_v61 = vld [vmem:[#allocation2 + $0x88] sm:$0xff] }
 0x321   : > { %v1952_v30 = vld [vmem:[#allocation2 + $0xc8] sm:$0xff] }
 0x323   : > { %2187 = vperm.xlu1 %2751, %v2029_v62   ;;  %2182 = vperm.xlu0 %2750, %v2028_v63   ;;  %v1943_v62 = vld [vmem:[#allocation2 + $0x80] sm:$0xff] }
 0x324   : > { %v1982_v5 = vadd.f32 %v3198_v1, %v1943_v62 }
 0x326   : > { %v1958_v54 = vld [vmem:[#allocation2 + $0xf8] sm:$0xff] }
 0x366   : > { %v2043_v7 = vpop.permute.xlu1 %2042  ;;  %v2033_v8 = vpop.permute.xlu0 %2032 }
 0x367   : > { %v2192_v9 = vmul.f32 %v2043_v7, %v1968_v3  ;;  %v2190_v10 = vmul.f32 %v2033_v8, %v1966_v4  ;;  %v1983_v4 = vadd.f32 %v3198_v1, %v1944_v61  ;;  %v1945_v7 = vld [vmem:[#allocation2 + $0x90] sm:$0xff] }
 0x368   : > { %v1984_v13 = vadd.f32 %v3198_v1, %v1945_v7 }
 0x369   : > { %2224 = vst.msk [vmem:[#allocation3 + $0x10] sm:$0xff] %vm915_vm5, %v2192_v9  ;;  %2222 = vst.msk [vmem:[#allocation3] sm:$0xff] %vm915_vm5, %v2190_v10 }
 0x36a   : > { %v2048_v15 = vpop.permute.xlu1 %2047  ;;  %v2038_v16 = vpop.permute.xlu0 %2037 }
 0x36b   : > { %v2193_v17 = vmul.f32 %v2048_v15, %v1969_v11  ;;  %v2191_v18 = vmul.f32 %v2038_v16, %v1967_v12  ;;  %v1985_v12 = vadd.f32 %v3198_v1, %v1946_v6  ;;  %v1947_v15 = vld [vmem:[#allocation2 + $0xa0] sm:$0xff] }
 0x36c   : > { %v1986_v21 = vadd.f32 %v3198_v1, %v1947_v15 }
 0x36d   : > { %2225 = vst.msk [vmem:[#allocation3 + $0x18] sm:$0xff] %vm915_vm5, %v2193_v17  ;;  %2223 = vst.msk [vmem:[#allocation3 + $0x8] sm:$0xff] %vm915_vm5, %v2191_v18 }
 0x36e   : > { %v2058_v23 = vpop.permute.xlu1 %2057  ;;  %v2053_v24 = vpop.permute.xlu0 %2052 }
 0x36f   : > { %v2195_v25 = vmul.f32 %v2058_v23, %v1971_v19  ;;  %v2194_v26 = vmul.f32 %v2053_v24, %v1970_v20  ;;  %v1987_v20 = vadd.f32 %v3198_v1, %v1948_v14  ;;  %v1949_v23 = vld [vmem:[#allocation2 + $0xb0] sm:$0xff] }
 0x370   : > { %v1988_v29 = vadd.f32 %v3198_v1, %v1949_v23 }
 0x371   : > { %2227 = vst.msk [vmem:[#allocation3 + $0x28] sm:$0xff] %vm915_vm5, %v2195_v25  ;;  %2226 = vst.msk [vmem:[#allocation3 + $0x20] sm:$0xff] %vm915_vm5, %v2194_v26 }
 0x372   : > { %v2068_v31 = vpop.permute.xlu1 %2067  ;;  %v2063_v32 = vpop.permute.xlu0 %2062 }
 0x373   : > { %v2197_v33 = vmul.f32 %v2068_v31, %v1973_v27  ;;  %v2196_v34 = vmul.f32 %v2063_v32, %v1972_v28  ;;  %v1989_v28 = vadd.f32 %v3198_v1, %v1950_v22  ;;  %v1951_v31 = vld [vmem:[#allocation2 + $0xc0] sm:$0xff] }
 0x374   : > { %v1990_v41 = vadd.f32 %v3198_v1, %v1951_v31 }
 0x375   : > { %2229 = vst.msk [vmem:[#allocation3 + $0x38] sm:$0xff] %vm915_vm5, %v2197_v33  ;;  %2228 = vst.msk [vmem:[#allocation3 + $0x30] sm:$0xff] %vm915_vm5, %v2196_v34 }
 0x376   : > { %v2078_v38 = vpop.permute.xlu1 %2077  ;;  %v2073_v42 = vpop.permute.xlu0 %2072 }
 0x377   : > { %v2199_v39 = vmul.f32 %v2078_v38, %v1975_v35  ;;  %v2198_v43 = vmul.f32 %v2073_v42, %v1974_v36  ;;  %v1991_v36 = vadd.f32 %v3198_v1, %v1952_v30  ;;  %v1953_v38 = vld [vmem:[#allocation2 + $0xd0] sm:$0xff] }
 0x378   : > { %v1992_v45 = vadd.f32 %v3198_v1, %v1953_v38 }
 0x379   : > { %2231 = vst.msk [vmem:[#allocation3 + $0x48] sm:$0xff] %vm915_vm5, %v2199_v39  ;;  %2230 = vst.msk [vmem:[#allocation3 + $0x40] sm:$0xff] %vm915_vm5, %v2198_v43 }
 0x37a   : > { %v2088_v47 = vpop.permute.xlu1 %2087  ;;  %v2083_v48 = vpop.permute.xlu0 %2082 }
 0x37b   : > { %v2201_v49 = vmul.f32 %v2088_v47, %v1977_v40  ;;  %v2200_v50 = vmul.f32 %v2083_v48, %v1976_v44  ;;  %v1993_v44 = vadd.f32 %v3198_v1, %v1954_v37  ;;  %v1955_v47 = vld [vmem:[#allocation2 + $0xe0] sm:$0xff] }
 0x37c   : > { %v1994_v53 = vadd.f32 %v3198_v1, %v1955_v47 }
 0x37d   : > { %2233 = vst.msk [vmem:[#allocation3 + $0x58] sm:$0xff] %vm915_vm5, %v2201_v49  ;;  %2232 = vst.msk [vmem:[#allocation3 + $0x50] sm:$0xff] %vm915_vm5, %v2200_v50 }
 0x37e   : > { %v2098_v55 = vpop.permute.xlu1 %2097  ;;  %v2093_v56 = vpop.permute.xlu0 %2092 }
 0x37f   : > { %v2203_v57 = vmul.f32 %v2098_v55, %v1979_v51  ;;  %v2202_v58 = vmul.f32 %v2093_v56, %v1978_v52  ;;  %v1995_v52 = vadd.f32 %v3198_v1, %v1956_v46  ;;  %v1957_v55 = vld [vmem:[#allocation2 + $0xf0] sm:$0xff] }
 0x380   : > { %v1996_v61 = vadd.f32 %v3198_v1, %v1957_v55 }
 0x381   : > { %2235 = vst.msk [vmem:[#allocation3 + $0x68] sm:$0xff] %vm915_vm5, %v2203_v57  ;;  %2234 = vst.msk [vmem:[#allocation3 + $0x60] sm:$0xff] %vm915_vm5, %v2202_v58 }
 0x382   : > { %v2108_v63 = vpop.permute.xlu1 %2107  ;;  %v2103_v0 = vpop.permute.xlu0 %2102 }
 0x383   : > { %v2205_v2 = vmul.f32 %v2108_v63, %v1981_v59  ;;  %v2204_v3 = vmul.f32 %v2103_v0, %v1980_v60  ;;  %v1997_v60 = vadd.f32 %v3198_v1, %v1958_v54 }
 0x385   : > { %2237 = vst.msk [vmem:[#allocation3 + $0x78] sm:$0xff] %vm915_vm5, %v2205_v2  ;;  %2236 = vst.msk [vmem:[#allocation3 + $0x70] sm:$0xff] %vm915_vm5, %v2204_v3 }
 0x386   : > { %v2118_v8 = vpop.permute.xlu1 %2117  ;;  %v2113_v9 = vpop.permute.xlu0 %2112 }
 0x387   : > { %v2207_v10 = vmul.f32 %v2118_v8, %v1983_v4  ;;  %v2206_v11 = vmul.f32 %v2113_v9, %v1982_v5 }
 0x389   : > { %2239 = vst.msk [vmem:[#allocation3 + $0x88] sm:$0xff] %vm915_vm5, %v2207_v10  ;;  %2238 = vst.msk [vmem:[#allocation3 + $0x80] sm:$0xff] %vm915_vm5, %v2206_v11 }
 0x38a   : > { %v2128_v16 = vpop.permute.xlu1 %2127  ;;  %v2123_v17 = vpop.permute.xlu0 %2122 }
 0x38b   : > { %v2209_v18 = vmul.f32 %v2128_v16, %v1985_v12  ;;  %v2208_v19 = vmul.f32 %v2123_v17, %v1984_v13 }
 0x38d   : > { %2241 = vst.msk [vmem:[#allocation3 + $0x98] sm:$0xff] %vm915_vm5, %v2209_v18  ;;  %2240 = vst.msk [vmem:[#allocation3 + $0x90] sm:$0xff] %vm915_vm5, %v2208_v19 }
 0x38e   : > { %v2138_v24 = vpop.permute.xlu1 %2137  ;;  %v2133_v25 = vpop.permute.xlu0 %2132 }
 0x38f   : > { %v2211_v26 = vmul.f32 %v2138_v24, %v1987_v20  ;;  %v2210_v27 = vmul.f32 %v2133_v25, %v1986_v21 }
 0x391   : > { %2243 = vst.msk [vmem:[#allocation3 + $0xa8] sm:$0xff] %vm915_vm5, %v2211_v26  ;;  %2242 = vst.msk [vmem:[#allocation3 + $0xa0] sm:$0xff] %vm915_vm5, %v2210_v27 }
 0x392   : > { %v2148_v32 = vpop.permute.xlu1 %2147  ;;  %v2143_v33 = vpop.permute.xlu0 %2142 }
 0x393   : > { %v2213_v34 = vmul.f32 %v2148_v32, %v1989_v28  ;;  %v2212_v35 = vmul.f32 %v2143_v33, %v1988_v29 }
 0x395   : > { %2245 = vst.msk [vmem:[#allocation3 + $0xb8] sm:$0xff] %vm915_vm5, %v2213_v34  ;;  %2244 = vst.msk [vmem:[#allocation3 + $0xb0] sm:$0xff] %vm915_vm5, %v2212_v35 }
 0x396   : > { %v2158_v42 = vpop.permute.xlu1 %2157  ;;  %v2153_v39 = vpop.permute.xlu0 %2152 }
 0x397   : > { %v2215_v43 = vmul.f32 %v2158_v42, %v1991_v36  ;;  %v2214_v40 = vmul.f32 %v2153_v39, %v1990_v41 }
 0x399   : > { %2247 = vst.msk [vmem:[#allocation3 + $0xc8] sm:$0xff] %vm915_vm5, %v2215_v43  ;;  %2246 = vst.msk [vmem:[#allocation3 + $0xc0] sm:$0xff] %vm915_vm5, %v2214_v40 }
 0x39a   : > { %v2168_v48 = vpop.permute.xlu1 %2167  ;;  %v2163_v49 = vpop.permute.xlu0 %2162 }
 0x39b   : > { %v2217_v50 = vmul.f32 %v2168_v48, %v1993_v44  ;;  %v2216_v51 = vmul.f32 %v2163_v49, %v1992_v45 }
 0x39d   : > { %2249 = vst.msk [vmem:[#allocation3 + $0xd8] sm:$0xff] %vm915_vm5, %v2217_v50  ;;  %2248 = vst.msk [vmem:[#allocation3 + $0xd0] sm:$0xff] %vm915_vm5, %v2216_v51 }
 0x39e   : > { %v2178_v56 = vpop.permute.xlu1 %2177  ;;  %v2173_v57 = vpop.permute.xlu0 %2172 }
 0x39f   : > { %v2219_v58 = vmul.f32 %v2178_v56, %v1995_v52  ;;  %v2218_v59 = vmul.f32 %v2173_v57, %v1994_v53 }
 0x3a1   : > { %2251 = vst.msk [vmem:[#allocation3 + $0xe8] sm:$0xff] %vm915_vm5, %v2219_v58  ;;  %2250 = vst.msk [vmem:[#allocation3 + $0xe0] sm:$0xff] %vm915_vm5, %v2218_v59 }
 0x3a2   : > { %v2188_v62 = vpop.permute.xlu1 %2187  ;;  %v2183_v63 = vpop.permute.xlu0 %2182 }
 0x3a3   : > { %v2221_v0 = vmul.f32 %v2188_v62, %v1997_v60  ;;  %v2220_v2 = vmul.f32 %v2183_v63, %v1996_v61 }
 0x3a5   : > { %2253 = vst.msk [vmem:[#allocation3 + $0xf8] sm:$0xff] %vm915_vm5, %v2221_v0  ;;  %2252 = vst.msk [vmem:[#allocation3 + $0xf0] sm:$0xff] %vm915_vm5, %v2220_v2 }
 0x3a6 PF: > { %p3266_p7 = scmp.eq.s32.totalorder %s2359_s21, 31  ;;  %s2810_s15 = smov [#allocation3]  }
 0x3a7   : > { %s2264_s16 = sshll.u32 %s2810_s15, 4  ;;  %s2265_s16 = int_to_ptr.vmem [resolvable:$true] %s2264_s16 }
 0x3a8   : > { %s2752_s17 = scalar_lea.vmem %s2265_s16, 4096  ;;  %p2759_p11 = scmp.lt.s32.totalorder %s2265_s16, %s2265_s16 }
 0x3a9   : > { %p2753_p8 = scmp.ne.s32.totalorder %s2265_s16, %s2752_s17  ;;  %p2760_p12 = scmp.lt.s32.totalorder %s2752_s17, %s2752_s17 }
 0x3ab   : > { %p2754_p9 = pnand %p2753_p8, %p3266_p7  ;;  %p2761_p13 = por %p2760_p12, %p2759_p11 }
 0x3ad   : > { %p2755_p10 = pneg %p2754_p9 }
 0x3af   : > { %p2762_p0 = pnand %p2761_p13, %p2755_p10 }
 0x3b1   : > { %2765 = shalt.err (!%p2762_p0)
}
 0x3b2   : > { %s2766_s21 = scalar_lea.hbm %s3306_s5, 4096 }
 0x3b3   : > { %p2767_p1 = scmp.ne.s32.totalorder %s3306_s5, %s2766_s21  ;;  %p2772_p4 = scmp.lt.u32.totalorder %s2766_s21, %s3306_s5 }
 0x3b5   : > { %p2768_p2 = pnand %p2767_p1, %p3266_p7 }
 0x3b7   : > { %p2769_p3 = pneg %p2768_p2 }
 0x3b9   : > { %p2774_p5 = pnand %p2772_p4, %p2769_p3 }
 0x3bb   : > { %2777 = shalt.err (!%p2774_p5)
}
 0x3bc   : > { %s2811_s28 = smov 128   ;;  %s2812_s29 = smov 8  }
 0x3bd   : > { %2707 = dma.vmem_to_hbm [thread:$0]  (%p3266_p7), %s2265_s16, 4096, %s3306_s5, [#allocation4], %s2811_s28, %s2811_s28, %s2812_s29  }
 0x3be   : > { %2791 = dma.done.wait (%p3266_p7), [#allocation4], 4096  }
 0x3bf   : > { %2793 = vsyncadd (%p3266_p7), [#allocation4], 4294963200 }
 0x3c0 PF: > { %s16_s20 = sadd.s32 1, %s2804_s20   ;;  %s3308_s18 = smov %s2800_s19 }
 0x3c1   : > { %p13_p6 = scmp.ge.s32.totalorder %s16_s20, 34   ;;  %s3309_s19 = smov %s3311_s22 }
 0x3c3   :  { %15 = sbr.rel (!%p13_p6) target bundleno = 2 (0x2), region = 100 }
 0x3ca   :  { %2280 = vsyncpa [#allocation4], 1 }
 0x3cb   :  { %2282 = vsyncpa [#allocation4 + $0x1], 1 }

</bundles_post_ra>
